<compile_context>
chip_gen: v7x
topology: tpu7x:2x2x1
jax: 0.10.0
libtpu: 0.0.40
codegen_flags: <defaults>
</compile_context>

<pallas_src>
import jax
import jax.numpy as jnp
from jax import lax
from jax.experimental import pallas as pl
from jax.experimental.pallas import tpu as pltpu

EPS = 1e-5
KS = 3          # conv kernel size (3x3)

_VMEM = pl.BlockSpec(memory_space=pltpu.MemorySpace.VMEM)


# ------------------------------ kernel helpers -------------------------------

def _im2col(x4d, oh, ow):
    """(N, H, W, C) value -> (N*oh*ow, 9*C) patch matrix, columns (kh,kw,c)-ordered.

    Only lane-preserving reshapes (collapse of leading dims) and contiguous
    slices are used; the 9 taps are concatenated along the lane axis so the
    conv becomes ONE 2-D matmul.
    """
    n, _, w, c = x4d.shape
    chunks = []
    for ki in range(KS):
        rows = x4d[:, ki:ki + oh, :, :]              # (N, oh, W, C)
        rows = rows.reshape(n * oh, w, c)            # merge leading dims
        for kj in range(KS):
            ck = rows[:, kj:kj + ow, :]              # (N*oh, ow, C)
            chunks.append(ck.reshape(n * oh * ow, c))
    return jnp.concatenate(chunks, axis=1)           # (M, 9*C)


def _bn_relu_rows(y, gamma, beta):
    """BN (train stats over rows) + ReLU. y: (M, C); gamma/beta: (1, C)."""
    m, c = y.shape
    inv_m = 1.0 / float(m)
    stats = jnp.sum(jnp.concatenate([y, y * y], axis=1),    # one reduction pass
                    axis=0, keepdims=True)                   # (1, 2C)
    mean = stats[:, :c] * inv_m
    var = jnp.maximum(stats[:, c:] * inv_m - mean * mean, 0.0)
    scale = gamma * lax.rsqrt(var + EPS)
    shift = beta - mean * scale
    return jnp.maximum(y * scale + shift, 0.0)


def _bn_relu_cols(y, gamma, beta):
    """BN (train stats over columns) + ReLU. y: (C, M); gamma/beta: (C, 1)."""
    c, m = y.shape
    inv_m = 1.0 / float(m)
    stats = jnp.sum(jnp.concatenate([y, y * y], axis=0),    # one reduction pass
                    axis=1, keepdims=True)                   # (2C, 1)
    mean = stats[:c] * inv_m
    var = jnp.maximum(stats[c:] * inv_m - mean * mean, 0.0)
    scale = gamma * lax.rsqrt(var + EPS)
    shift = beta - mean * scale
    return jnp.maximum(y * scale + shift, 0.0)


# ------------------------------ fused kernel --------------------------------

def _encoder_kernel(x_ref, w1_ref, w2_ref, g1_ref, b1_ref, g2_ref, b2_ref,
                    o_ref):
    # x_ref: (N, PH, 2, PW, 2*Cin) -- free reshape view of the NHWC input:
    #   axis 2 is the pool window's dh, the last axis is (dw, cin).
    xv = x_ref[...]
    n, ph, _, pw, c2in = xv.shape
    cin = c2in // 2

    # maxpool 2x2 / stride 2 (pure VPU max, no strided access needed).
    hm = jnp.maximum(xv[:, :, 0, :, :], xv[:, :, 1, :, :])    # (N, PH, PW, 2*Cin)
    pooled = jnp.maximum(hm[..., :cin], hm[..., cin:])        # (N, PH, PW, Cin)

    c1 = w1_ref.shape[0]
    oh1, ow1 = ph - KS + 1, pw - KS + 1
    oh2, ow2 = oh1 - KS + 1, ow1 - KS + 1

    # conv1: ONE (M1, 9*Cin) . (C1, 9*Cin)^T matmul, f32 accumulation.
    p1 = _im2col(pooled, oh1, ow1)                            # (M1, 9*Cin)
    y1 = jnp.einsum("mk,ck->mc", p1, w1_ref[...],
                    preferred_element_type=jnp.float32)       # (M1, C1)
    h1 = _bn_relu_rows(y1, g1_ref[...], b1_ref[...])          # (M1, C1)

    # conv2, computed channel-major so the store is NCHW-direct:
    #   y2t = W2 (C2, 9*C1) . P2^T  -> (C2, M2)   (still ONE matmul)
    h1r = h1.reshape(n, oh1, ow1, c1)
    p2 = _im2col(h1r, oh2, ow2)                               # (M2, 9*C1)
    y2t = jnp.einsum("ck,mk->cm", w2_ref[...], p2,
                     preferred_element_type=jnp.float32)      # (C2, M2)
    h2t = _bn_relu_cols(y2t, g2_ref[...], b2_ref[...])        # (C2, M2)

    # NCHW-flat output (N*C2, OH2*OW2): stack per-image channel blocks.
    s2 = oh2 * ow2
    out = jnp.concatenate([h2t[:, i * s2:(i + 1) * s2] for i in range(n)],
                          axis=0)
    o_ref[...] = out.astype(o_ref.dtype)


# ------------------------------ JAX wrapper ----------------------------------

def encoder_layer_forward(x_nchw, params):
    """EncoderLayer forward. NCHW in / NCHW out (PyTorch convention)."""
    n, cin, h, w = x_nchw.shape
    ph, pw = h // 2, w // 2
    c1 = params["w1"].shape[0]
    c2 = params["w2"].shape[0]
    oh1, ow1 = ph - KS + 1, pw - KS + 1
    oh2, ow2 = oh1 - KS + 1, ow1 - KS + 1

    # One NCHW->NHWC transpose (channels become the matmul contraction dim),
    # then a FREE reshape exposing the 2x2 pool window for the in-kernel max.
    x = jnp.transpose(x_nchw, (0, 2, 3, 1))                   # (N, H, W, Cin)
    x = x.reshape(n, ph, 2, pw, 2 * cin)

    # Conv weights (Cout, Cin, KH, KW) -> (Cout, KH*KW*Cin); patch columns are
    # built in the same (kh, kw, cin) order inside the kernel.
    w1t = jnp.transpose(params["w1"], (0, 2, 3, 1)).reshape(c1, KS * KS * cin)
    w2t = jnp.transpose(params["w2"], (0, 2, 3, 1)).reshape(c2, KS * KS * c1)
    g1 = params["gamma1"].reshape(1, c1)
    b1 = params["beta1"].reshape(1, c1)
    g2 = params["gamma2"].reshape(c2, 1)
    b2 = params["beta2"].reshape(c2, 1)

    out = pl.pallas_call(
        _encoder_kernel,
        out_shape=jax.ShapeDtypeStruct((n * c2, oh2 * ow2), jnp.float32),
        in_specs=[_VMEM] * 7,
        out_specs=_VMEM,
    )(x, w1t, w2t, g1, b1, g2, b2)

    # Free reshape: rows are already (n, c)-ordered, columns (oh, ow)-ordered.
    return out.reshape(n, c2, oh2, ow2)


# ------------------------- pure-JAX reference check --------------------------

def _reference(x_nchw, params):
    hi = lax.Precision.HIGHEST

    def pool(x):  # NHWC
        return jnp.max(
            jnp.stack([x[:, dh::2, dw::2, :] for dh in range(2) for dw in range(2)], 0),
            axis=0)

    def im2col(x, kh, kw):
        n, h, w, c = x.shape
        oh, ow = h - kh + 1, w - kw + 1
        cols = [x[:, i:i + oh, j:j + ow, :] for i in range(kh) for j in range(kw)]
        p = jnp.stack(cols, axis=3)                     # (N, OH, OW, kh*kw, C)
        return p.reshape(n * oh * ow, kh * kw * c), (n, oh, ow)

    def conv_bn_relu_ref(x, w, g, b):
        cout, cin, kh, kw = w.shape
        p, (n, oh, ow) = im2col(x, kh, kw)
        wm = jnp.transpose(w, (2, 3, 1, 0)).reshape(kh * kw * cin, cout)
        y = jnp.dot(p, wm, precision=hi)
        mean = jnp.mean(y, axis=0, keepdims=True)
        var = jnp.mean((y - mean) ** 2, axis=0, keepdims=True)   # biased
        y = (y - mean) / jnp.sqrt(var + EPS) * g.reshape(1, -1) + b.reshape(1, -1)
        return jnp.maximum(y, 0.0).reshape(n, oh, ow, cout)

    x = jnp.transpose(x_nchw, (0, 2, 3, 1))
    x = pool(x)
    x = conv_bn_relu_ref(x, params["w1"], params["gamma1"], params["beta1"])
    x = conv_bn_relu_ref(x, params["w2"], params["gamma2"], params["beta2"])
    return jnp.transpose(x, (0, 3, 1, 2))


# ---------------------------------- main -------------------------------------

if __name__ == "__main__":
    # EncoderLayer(in_channel=4, out_channel=8, kernel_size=3)
    in_channel, out_channel = 4, 8
    key = jax.random.PRNGKey(0)
    kx, k1, k2, kg1, kb1, kg2, kb2 = jax.random.split(key, 7)

    x = jax.random.normal(kx, (2, in_channel, 16, 16), jnp.float32)

    params = {
        "w1": 0.1 * jax.random.normal(k1, (out_channel, in_channel, 3, 3), jnp.float32),
        "w2": 0.1 * jax.random.normal(k2, (out_channel, out_channel, 3, 3), jnp.float32),
        "gamma1": 1.0 + 0.1 * jax.random.normal(kg1, (out_channel,), jnp.float32),
        "beta1": 0.1 * jax.random.normal(kb1, (out_channel,), jnp.float32),
        "gamma2": 1.0 + 0.1 * jax.random.normal(kg2, (out_channel,), jnp.float32),
        "beta2": 0.1 * jax.random.normal(kb2, (out_channel,), jnp.float32),
    }

    out = jax.jit(encoder_layer_forward)(x, params)
    out = jax.block_until_ready(out)

    # x(2,4,16,16) -> pool (2,4,8,8) -> conv1 (2,8,6,6) -> conv2 (2,8,4,4)
    assert out.shape == (2, out_channel, 4, 4), out.shape

    ref = _reference(x, params)
    max_err = float(jnp.max(jnp.abs(out - ref)))
    assert jnp.allclose(out, ref, atol=2e-3, rtol=2e-3), max_err

    # TODO(synk): BatchNorm running_mean/running_var updates are a stateful
    # training side effect and are not materialized here (forward output unaffected).
    print("KERNEL_OK")
</pallas_src>

<mosaic_0001>
module attributes {stable_mosaic.version = 11 : i64} {
  func.func @_encoder_kernel(%arg0: memref<2x8x2x8x8xf32, #tpu.memory_space<vmem>>, %arg1: memref<8x36xf32, #tpu.memory_space<vmem>>, %arg2: memref<8x72xf32, #tpu.memory_space<vmem>>, %arg3: memref<1x8xf32, #tpu.memory_space<vmem>>, %arg4: memref<1x8xf32, #tpu.memory_space<vmem>>, %arg5: memref<8x1xf32, #tpu.memory_space<vmem>>, %arg6: memref<8x1xf32, #tpu.memory_space<vmem>>, %arg7: memref<16x16xf32, #tpu.memory_space<vmem>>) attributes {dimension_semantics = [], scalar_prefetch = 0 : i64, scratch_operands = 0 : i64, tpu.core_type = #tpu.core_type<tc>} {
    %c0 = arith.constant 0 : index
    %c0_0 = arith.constant 0 : index
    %c0_1 = arith.constant 0 : index
    %c0_2 = arith.constant 0 : index
    %c0_3 = arith.constant 0 : index
    %0 = vector.load %arg0[%c0, %c0_0, %c0_1, %c0_2, %c0_3] : memref<2x8x2x8x8xf32, #tpu.memory_space<vmem>>, vector<2x8x2x8x8xf32>
    %1 = vector.extract_strided_slice %0 {offsets = [0, 0, 0, 0, 0], sizes = [2, 8, 1, 8, 8], strides = [1, 1, 1, 1, 1]} : vector<2x8x2x8x8xf32> to vector<2x8x1x8x8xf32>
    %2 = vector.shape_cast %1 : vector<2x8x1x8x8xf32> to vector<2x8x8x8xf32>
    %3 = vector.extract_strided_slice %0 {offsets = [0, 0, 1, 0, 0], sizes = [2, 8, 1, 8, 8], strides = [1, 1, 1, 1, 1]} : vector<2x8x2x8x8xf32> to vector<2x8x1x8x8xf32>
    %4 = vector.shape_cast %3 : vector<2x8x1x8x8xf32> to vector<2x8x8x8xf32>
    %5 = arith.maximumf %2, %4 : vector<2x8x8x8xf32>
    %6 = vector.extract_strided_slice %5 {offsets = [0, 0, 0, 0], sizes = [2, 8, 8, 4], strides = [1, 1, 1, 1]} : vector<2x8x8x8xf32> to vector<2x8x8x4xf32>
    %7 = vector.extract_strided_slice %5 {offsets = [0, 0, 0, 4], sizes = [2, 8, 8, 4], strides = [1, 1, 1, 1]} : vector<2x8x8x8xf32> to vector<2x8x8x4xf32>
    %8 = arith.maximumf %6, %7 : vector<2x8x8x4xf32>
    %9 = vector.extract_strided_slice %8 {offsets = [0, 0, 0, 0], sizes = [2, 6, 8, 4], strides = [1, 1, 1, 1]} : vector<2x8x8x4xf32> to vector<2x6x8x4xf32>
    %10 = vector.shape_cast %9 : vector<2x6x8x4xf32> to vector<12x8x4xf32>
    %11 = vector.extract_strided_slice %10 {offsets = [0, 0, 0], sizes = [12, 6, 4], strides = [1, 1, 1]} : vector<12x8x4xf32> to vector<12x6x4xf32>
    %12 = vector.shape_cast %11 : vector<12x6x4xf32> to vector<72x4xf32>
    %13 = vector.extract_strided_slice %10 {offsets = [0, 1, 0], sizes = [12, 6, 4], strides = [1, 1, 1]} : vector<12x8x4xf32> to vector<12x6x4xf32>
    %14 = vector.shape_cast %13 : vector<12x6x4xf32> to vector<72x4xf32>
    %15 = vector.extract_strided_slice %10 {offsets = [0, 2, 0], sizes = [12, 6, 4], strides = [1, 1, 1]} : vector<12x8x4xf32> to vector<12x6x4xf32>
    %16 = vector.shape_cast %15 : vector<12x6x4xf32> to vector<72x4xf32>
    %17 = vector.extract_strided_slice %8 {offsets = [0, 1, 0, 0], sizes = [2, 6, 8, 4], strides = [1, 1, 1, 1]} : vector<2x8x8x4xf32> to vector<2x6x8x4xf32>
    %18 = vector.shape_cast %17 : vector<2x6x8x4xf32> to vector<12x8x4xf32>
    %19 = vector.extract_strided_slice %18 {offsets = [0, 0, 0], sizes = [12, 6, 4], strides = [1, 1, 1]} : vector<12x8x4xf32> to vector<12x6x4xf32>
    %20 = vector.shape_cast %19 : vector<12x6x4xf32> to vector<72x4xf32>
    %21 = vector.extract_strided_slice %18 {offsets = [0, 1, 0], sizes = [12, 6, 4], strides = [1, 1, 1]} : vector<12x8x4xf32> to vector<12x6x4xf32>
    %22 = vector.shape_cast %21 : vector<12x6x4xf32> to vector<72x4xf32>
    %23 = vector.extract_strided_slice %18 {offsets = [0, 2, 0], sizes = [12, 6, 4], strides = [1, 1, 1]} : vector<12x8x4xf32> to vector<12x6x4xf32>
    %24 = vector.shape_cast %23 : vector<12x6x4xf32> to vector<72x4xf32>
    %25 = vector.extract_strided_slice %8 {offsets = [0, 2, 0, 0], sizes = [2, 6, 8, 4], strides = [1, 1, 1, 1]} : vector<2x8x8x4xf32> to vector<2x6x8x4xf32>
    %26 = vector.shape_cast %25 : vector<2x6x8x4xf32> to vector<12x8x4xf32>
    %27 = vector.extract_strided_slice %26 {offsets = [0, 0, 0], sizes = [12, 6, 4], strides = [1, 1, 1]} : vector<12x8x4xf32> to vector<12x6x4xf32>
    %28 = vector.shape_cast %27 : vector<12x6x4xf32> to vector<72x4xf32>
    %29 = vector.extract_strided_slice %26 {offsets = [0, 1, 0], sizes = [12, 6, 4], strides = [1, 1, 1]} : vector<12x8x4xf32> to vector<12x6x4xf32>
    %30 = vector.shape_cast %29 : vector<12x6x4xf32> to vector<72x4xf32>
    %31 = vector.extract_strided_slice %26 {offsets = [0, 2, 0], sizes = [12, 6, 4], strides = [1, 1, 1]} : vector<12x8x4xf32> to vector<12x6x4xf32>
    %32 = vector.shape_cast %31 : vector<12x6x4xf32> to vector<72x4xf32>
    %33 = tpu.concatenate %12, %14, %16, %20, %22, %24, %28, %30, %32 in 1 : vector<72x4xf32>, vector<72x4xf32>, vector<72x4xf32>, vector<72x4xf32>, vector<72x4xf32>, vector<72x4xf32>, vector<72x4xf32>, vector<72x4xf32>, vector<72x4xf32> -> vector<72x36xf32>
    %c0_4 = arith.constant 0 : index
    %c0_5 = arith.constant 0 : index
    %34 = vector.load %arg1[%c0_4, %c0_5] : memref<8x36xf32, #tpu.memory_space<vmem>>, vector<8x36xf32>
    "tpu.trace_start"() <{level = 10 : i32, message = "mk,ck->mc"}> : () -> ()
    %cst = arith.constant dense<0.000000e+00> : vector<72x8xf32>
    %35 = tpu.matmul %33, %34, %cst {dimension_numbers = #tpu.dot_dimension_numbers<[1], [1], [0], [0], [0, 0, 1, 0], [], []>} : vector<72x36xf32>, vector<8x36xf32>, vector<72x8xf32> -> vector<72x8xf32>
    "tpu.trace_stop"() : () -> ()
    %c0_6 = arith.constant 0 : index
    %c0_7 = arith.constant 0 : index
    %36 = vector.load %arg3[%c0_6, %c0_7] : memref<1x8xf32, #tpu.memory_space<vmem>>, vector<1x8xf32>
    %c0_8 = arith.constant 0 : index
    %c0_9 = arith.constant 0 : index
    %37 = vector.load %arg4[%c0_8, %c0_9] : memref<1x8xf32, #tpu.memory_space<vmem>>, vector<1x8xf32>
    %38 = arith.mulf %35, %35 : vector<72x8xf32>
    %39 = tpu.concatenate %35, %38 in 1 : vector<72x8xf32>, vector<72x8xf32> -> vector<72x16xf32>
    %cst_10 = arith.constant dense<0.000000e+00> : vector<16xf32>
    %40 = vector.multi_reduction <add>, %39, %cst_10 [0] : vector<72x16xf32> to vector<16xf32>
    %41 = vector.shape_cast %40 : vector<16xf32> to vector<1x16xf32>
    %42 = vector.extract_strided_slice %41 {offsets = [0, 0], sizes = [1, 8], strides = [1, 1]} : vector<1x16xf32> to vector<1x8xf32>
    %cst_11 = arith.constant 0.013888889 : f32
    %43 = vector.broadcast %cst_11 : f32 to vector<1x8xf32>
    %44 = arith.mulf %42, %43 : vector<1x8xf32>
    %45 = vector.extract_strided_slice %41 {offsets = [0, 8], sizes = [1, 8], strides = [1, 1]} : vector<1x16xf32> to vector<1x8xf32>
    %cst_12 = arith.constant 0.013888889 : f32
    %46 = vector.broadcast %cst_12 : f32 to vector<1x8xf32>
    %47 = arith.mulf %45, %46 : vector<1x8xf32>
    %48 = arith.mulf %44, %44 : vector<1x8xf32>
    %49 = arith.subf %47, %48 : vector<1x8xf32>
    %cst_13 = arith.constant 0.000000e+00 : f32
    %50 = vector.broadcast %cst_13 : f32 to vector<1x8xf32>
    %51 = arith.maximumf %49, %50 : vector<1x8xf32>
    %cst_14 = arith.constant 9.99999974E-6 : f32
    %52 = vector.broadcast %cst_14 : f32 to vector<1x8xf32>
    %53 = arith.addf %51, %52 : vector<1x8xf32>
    %54 = math.rsqrt %53 : vector<1x8xf32>
    %55 = arith.mulf %36, %54 : vector<1x8xf32>
    %56 = arith.mulf %44, %55 : vector<1x8xf32>
    %57 = arith.subf %37, %56 : vector<1x8xf32>
    %58 = vector.broadcast %55 : vector<1x8xf32> to vector<72x8xf32>
    %59 = arith.mulf %35, %58 : vector<72x8xf32>
    %60 = vector.broadcast %57 : vector<1x8xf32> to vector<72x8xf32>
    %61 = arith.addf %59, %60 : vector<72x8xf32>
    %cst_15 = arith.constant 0.000000e+00 : f32
    %62 = vector.broadcast %cst_15 : f32 to vector<72x8xf32>
    %63 = arith.maximumf %61, %62 : vector<72x8xf32>
    %64 = vector.shape_cast %63 : vector<72x8xf32> to vector<2x6x6x8xf32>
    %65 = vector.extract_strided_slice %64 {offsets = [0, 0, 0, 0], sizes = [2, 4, 6, 8], strides = [1, 1, 1, 1]} : vector<2x6x6x8xf32> to vector<2x4x6x8xf32>
    %66 = vector.shape_cast %65 : vector<2x4x6x8xf32> to vector<8x6x8xf32>
    %67 = vector.extract_strided_slice %66 {offsets = [0, 0, 0], sizes = [8, 4, 8], strides = [1, 1, 1]} : vector<8x6x8xf32> to vector<8x4x8xf32>
    %68 = vector.shape_cast %67 : vector<8x4x8xf32> to vector<32x8xf32>
    %69 = vector.extract_strided_slice %66 {offsets = [0, 1, 0], sizes = [8, 4, 8], strides = [1, 1, 1]} : vector<8x6x8xf32> to vector<8x4x8xf32>
    %70 = vector.shape_cast %69 : vector<8x4x8xf32> to vector<32x8xf32>
    %71 = vector.extract_strided_slice %66 {offsets = [0, 2, 0], sizes = [8, 4, 8], strides = [1, 1, 1]} : vector<8x6x8xf32> to vector<8x4x8xf32>
    %72 = vector.shape_cast %71 : vector<8x4x8xf32> to vector<32x8xf32>
    %73 = vector.extract_strided_slice %64 {offsets = [0, 1, 0, 0], sizes = [2, 4, 6, 8], strides = [1, 1, 1, 1]} : vector<2x6x6x8xf32> to vector<2x4x6x8xf32>
    %74 = vector.shape_cast %73 : vector<2x4x6x8xf32> to vector<8x6x8xf32>
    %75 = vector.extract_strided_slice %74 {offsets = [0, 0, 0], sizes = [8, 4, 8], strides = [1, 1, 1]} : vector<8x6x8xf32> to vector<8x4x8xf32>
    %76 = vector.shape_cast %75 : vector<8x4x8xf32> to vector<32x8xf32>
    %77 = vector.extract_strided_slice %74 {offsets = [0, 1, 0], sizes = [8, 4, 8], strides = [1, 1, 1]} : vector<8x6x8xf32> to vector<8x4x8xf32>
    %78 = vector.shape_cast %77 : vector<8x4x8xf32> to vector<32x8xf32>
    %79 = vector.extract_strided_slice %74 {offsets = [0, 2, 0], sizes = [8, 4, 8], strides = [1, 1, 1]} : vector<8x6x8xf32> to vector<8x4x8xf32>
    %80 = vector.shape_cast %79 : vector<8x4x8xf32> to vector<32x8xf32>
    %81 = vector.extract_strided_slice %64 {offsets = [0, 2, 0, 0], sizes = [2, 4, 6, 8], strides = [1, 1, 1, 1]} : vector<2x6x6x8xf32> to vector<2x4x6x8xf32>
    %82 = vector.shape_cast %81 : vector<2x4x6x8xf32> to vector<8x6x8xf32>
    %83 = vector.extract_strided_slice %82 {offsets = [0, 0, 0], sizes = [8, 4, 8], strides = [1, 1, 1]} : vector<8x6x8xf32> to vector<8x4x8xf32>
    %84 = vector.shape_cast %83 : vector<8x4x8xf32> to vector<32x8xf32>
    %85 = vector.extract_strided_slice %82 {offsets = [0, 1, 0], sizes = [8, 4, 8], strides = [1, 1, 1]} : vector<8x6x8xf32> to vector<8x4x8xf32>
    %86 = vector.shape_cast %85 : vector<8x4x8xf32> to vector<32x8xf32>
    %87 = vector.extract_strided_slice %82 {offsets = [0, 2, 0], sizes = [8, 4, 8], strides = [1, 1, 1]} : vector<8x6x8xf32> to vector<8x4x8xf32>
    %88 = vector.shape_cast %87 : vector<8x4x8xf32> to vector<32x8xf32>
    %89 = tpu.concatenate %68, %70, %72, %76, %78, %80, %84, %86, %88 in 1 : vector<32x8xf32>, vector<32x8xf32>, vector<32x8xf32>, vector<32x8xf32>, vector<32x8xf32>, vector<32x8xf32>, vector<32x8xf32>, vector<32x8xf32>, vector<32x8xf32> -> vector<32x72xf32>
    %c0_16 = arith.constant 0 : index
    %c0_17 = arith.constant 0 : index
    %90 = vector.load %arg2[%c0_16, %c0_17] : memref<8x72xf32, #tpu.memory_space<vmem>>, vector<8x72xf32>
    "tpu.trace_start"() <{level = 10 : i32, message = "ck,mk->cm"}> : () -> ()
    %cst_18 = arith.constant dense<0.000000e+00> : vector<8x32xf32>
    %91 = tpu.matmul %90, %89, %cst_18 {dimension_numbers = #tpu.dot_dimension_numbers<[1], [1], [0], [0], [0, 0, 1, 0], [], []>} : vector<8x72xf32>, vector<32x72xf32>, vector<8x32xf32> -> vector<8x32xf32>
    "tpu.trace_stop"() : () -> ()
    %c0_19 = arith.constant 0 : index
    %c0_20 = arith.constant 0 : index
    %92 = vector.load %arg5[%c0_19, %c0_20] : memref<8x1xf32, #tpu.memory_space<vmem>>, vector<8x1xf32>
    %c0_21 = arith.constant 0 : index
    %c0_22 = arith.constant 0 : index
    %93 = vector.load %arg6[%c0_21, %c0_22] : memref<8x1xf32, #tpu.memory_space<vmem>>, vector<8x1xf32>
    %94 = arith.mulf %91, %91 : vector<8x32xf32>
    %95 = tpu.concatenate %91, %94 in 0 : vector<8x32xf32>, vector<8x32xf32> -> vector<16x32xf32>
    %cst_23 = arith.constant dense<0.000000e+00> : vector<16xf32>
    %96 = vector.multi_reduction <add>, %95, %cst_23 [1] : vector<16x32xf32> to vector<16xf32>
    %97 = vector.shape_cast %96 : vector<16xf32> to vector<16x1xf32>
    %98 = vector.extract_strided_slice %97 {offsets = [0, 0], sizes = [8, 1], strides = [1, 1]} : vector<16x1xf32> to vector<8x1xf32>
    %cst_24 = arith.constant 3.125000e-02 : f32
    %99 = vector.broadcast %cst_24 : f32 to vector<8x1xf32>
    %100 = arith.mulf %98, %99 : vector<8x1xf32>
    %101 = vector.extract_strided_slice %97 {offsets = [8, 0], sizes = [8, 1], strides = [1, 1]} : vector<16x1xf32> to vector<8x1xf32>
    %cst_25 = arith.constant 3.125000e-02 : f32
    %102 = vector.broadcast %cst_25 : f32 to vector<8x1xf32>
    %103 = arith.mulf %101, %102 : vector<8x1xf32>
    %104 = arith.mulf %100, %100 : vector<8x1xf32>
    %105 = arith.subf %103, %104 : vector<8x1xf32>
    %cst_26 = arith.constant 0.000000e+00 : f32
    %106 = vector.broadcast %cst_26 : f32 to vector<8x1xf32>
    %107 = arith.maximumf %105, %106 : vector<8x1xf32>
    %cst_27 = arith.constant 9.99999974E-6 : f32
    %108 = vector.broadcast %cst_27 : f32 to vector<8x1xf32>
    %109 = arith.addf %107, %108 : vector<8x1xf32>
    %110 = math.rsqrt %109 : vector<8x1xf32>
    %111 = arith.mulf %92, %110 : vector<8x1xf32>
    %112 = arith.mulf %100, %111 : vector<8x1xf32>
    %113 = arith.subf %93, %112 : vector<8x1xf32>
    %114 = vector.broadcast %111 : vector<8x1xf32> to vector<8x32xf32>
    %115 = arith.mulf %91, %114 : vector<8x32xf32>
    %116 = vector.broadcast %113 : vector<8x1xf32> to vector<8x32xf32>
    %117 = arith.addf %115, %116 : vector<8x32xf32>
    %cst_28 = arith.constant 0.000000e+00 : f32
    %118 = vector.broadcast %cst_28 : f32 to vector<8x32xf32>
    %119 = arith.maximumf %117, %118 : vector<8x32xf32>
    %120 = vector.extract_strided_slice %119 {offsets = [0, 0], sizes = [8, 16], strides = [1, 1]} : vector<8x32xf32> to vector<8x16xf32>
    %121 = vector.extract_strided_slice %119 {offsets = [0, 16], sizes = [8, 16], strides = [1, 1]} : vector<8x32xf32> to vector<8x16xf32>
    %122 = tpu.concatenate %120, %121 in 0 : vector<8x16xf32>, vector<8x16xf32> -> vector<16x16xf32>
    %c0_29 = arith.constant 0 : index
    %c0_30 = arith.constant 0 : index
    %123 = vector.load %arg7[%c0_29, %c0_30] : memref<16x16xf32, #tpu.memory_space<vmem>>, vector<16x16xf32>
    tpu.vector_store %arg7[%c0_29, %c0_30], %122 {strides = array<i32>} : memref<16x16xf32, #tpu.memory_space<vmem>>, vector<16x16xf32>,
    return
  }
}

</mosaic_0001>

<bundles_post_ra>
// kernel: encoder_layer_forward.1
= control target key start
LH: loop header
LB: loop body
LE: loop exit
PB: predicated region body
PF: predicated region fallthrough
CT: control target
= control target key end

     0   :  { %s3256_s17 = smov 124   ;;  %v3257_v48 = vmov 1983009808   ;;  %v170_v50 = vlaneseq  ;;  %s3260_s22 = smov 20   ;;  %vm370_vm0 = vcmask 1040384   ;;  %vm371_vm1 = vcmask 1042434   ;;  %s5201_s0 = inlined_call_operand.vmem [shape: f32[2,8,2,8,8], index: 0, kind: input, shape index: {}]   ;;  %s5202_s1 = inlined_call_operand.vmem [shape: f32[8,36], index: 1, kind: input, shape index: {}]   ;;  %s5203_s3 = inlined_call_operand.vmem [shape: f32[1,8], index: 3, kind: input, shape index: {}]   ;;  %s5204_s4 = inlined_call_operand.vmem [shape: f32[1,8], index: 4, kind: input, shape index: {}]   ;;  %s5205_s2 = inlined_call_operand.vmem [shape: f32[8,72], index: 2, kind: input, shape index: {}]   ;;  %s5206_s5 = inlined_call_operand.vmem [shape: f32[8,1], index: 5, kind: input, shape index: {}]   ;;  %s5207_s6 = inlined_call_operand.vmem [shape: f32[8,1], index: 6, kind: input, shape index: {}]   ;;  %s5208_s7 = inlined_call_operand.vmem [shape: f32[16,16], index: 7, kind: output, shape index: {}]  }
   0x1   :  { %v30_v0 = vld [vmem:[%s5201_s0 + $0x20] sm:$0xff]  ;;  %v31_v1 = vld [vmem:[%s5201_s0 + $0x28] sm:$0xff]  ;;  %v32_v5 = vld [vmem:[%s5201_s0 + $0x30] sm:$0xff]  ;;  %v168_v49 = vunpack.c.l.s4 %v3257_v48  ;;  %s3261_s23 = smov 24   ;;  %s3262_s24 = smov 32   ;;  %vm373_vm2 = vcmask 1044484  }
   0x2   :  { %v26_v2 = vld [vmem:[%s5201_s0] sm:$0xff]  ;;  %v3326_v3 = vmax.f32 %v30_v0, %v31_v1  ;;  %v27_v4 = vld [vmem:[%s5201_s0 + $0x8] sm:$0xff]  ;;  %v33_v6 = vld [vmem:[%s5201_s0 + $0x38] sm:$0xff]  ;;  %v3477_v52 = vshrl.u32 %v170_v50, 7  ;;  %vm375_vm3 = vcmask 1046534   ;;  %s3263_s25 = smov 4  }
   0x3   :  { %v3337_v7 = vmax.f32 %v26_v2, %v27_v4  ;;  %v28_v8 = vld [vmem:[%s5201_s0 + $0x10] sm:$0xff]  ;;  %v29_v9 = vld [vmem:[%s5201_s0 + $0x18] sm:$0xff]  ;;  %v3347_v10 = vmax.f32 %v32_v5, %v33_v6  ;;  %v42_v12 = vld [vmem:[%s5201_s0 + $0x80] sm:$0xff]  ;;  %v169_v51 = vunpack.c.0.s8 %v168_v49  ;;  %s3264_s26 = smov 16   ;;  %s3265_s27 = smov 28   ;;  %vm1908_vm7 = vcmask 293888  }
   0x4   :  { %94 = vrot.lane.b32.xlu1 %v3326_v3, %s3256_s17  ;;  %v3351_v11 = vmax.f32 %v28_v8, %v29_v9  ;;  %v43_v13 = vld [vmem:[%s5201_s0 + $0x88] sm:$0xff]  ;;  %v34_v14 = vld [vmem:[%s5201_s0 + $0x40] sm:$0xff]  ;;  %v36_v18 = vld [vmem:[%s5201_s0 + $0x50] sm:$0xff]  ;;  %5249 = vst [vmem:[#allocation4_spill] sm:$0xff] %v3477_v52  ;;  %vm3267_vm8 = vmmov 0   ;;  %vm1827_vm9 = vcmask 31744  }
   0x5   :  { %90 = vrot.lane.b32.xlu0 %v3337_v7, %s3256_s17  ;;  %v35_v15 = vld [vmem:[%s5201_s0 + $0x48] sm:$0xff]  ;;  %v3367_v16 = vmax.f32 %v42_v12, %v43_v13  ;;  %v37_v19 = vld [vmem:[%s5201_s0 + $0x58] sm:$0xff]  ;;  %v44_v20 = vld [vmem:[%s5201_s0 + $0x90] sm:$0xff]  ;;  %v3480_v53 = vsub.s32 %v169_v51, %v3477_v52  ;;  %vm1837_vm10 = vcmask 64512   ;;  %vm1847_vm11 = vcmask 97280   ;;  %s3272_s11 = smov 64  }
   0x6   :  { %v3371_v17 = vmax.f32 %v34_v14, %v35_v15  ;;  %v45_v21 = vld [vmem:[%s5201_s0 + $0x98] sm:$0xff]  ;;  %v3387_v22 = vmax.f32 %v36_v18, %v37_v19  ;;  %v38_v24 = vld [vmem:[%s5201_s0 + $0x60] sm:$0xff]  ;;  %v39_v25 = vld [vmem:[%s5201_s0 + $0x68] sm:$0xff]  ;;  %vm1857_vm12 = vcmask 130048   ;;  %vm1867_vm13 = vcmask 162816   ;;  %s3273_s12 = smov 56  }
   0x7   :  { %v3391_v23 = vmax.f32 %v44_v20, %v45_v21  ;;  %v46_v26 = vld [vmem:[%s5201_s0 + $0xa0] sm:$0xff]  ;;  %v47_v27 = vld [vmem:[%s5201_s0 + $0xa8] sm:$0xff]  ;;  %v3407_v28 = vmax.f32 %v38_v24, %v39_v25  ;;  %v40_v29 = vld [vmem:[%s5201_s0 + $0x70] sm:$0xff]  ;;  %vm1877_vm14 = vcmask 195584   ;;  %vm1887_vm15 = vcmask 228352   ;;  %s3276_s19 = smov 112  }
   0x8   :  { %96 = vrot.lane.b32.xlu1 %v3347_v10, %s3256_s17  ;;  %v41_v30 = vld [vmem:[%s5201_s0 + $0x78] sm:$0xff]  ;;  %v3417_v31 = vmax.f32 %v46_v26, %v47_v27  ;;  %v48_v32 = vld [vmem:[%s5201_s0 + $0xb0] sm:$0xff]  ;;  %v50_v38 = vld [vmem:[%s5201_s0 + $0xc0] sm:$0xff] }
   0x9   :  { %92 = vrot.lane.b32.xlu0 %v3351_v11, %s3256_s17  ;;  %v49_v33 = vld [vmem:[%s5201_s0 + $0xb8] sm:$0xff]  ;;  %v3427_v34 = vmax.f32 %v40_v29, %v41_v30  ;;  %v52_v36 = vld [vmem:[%s5201_s0 + $0xd0] sm:$0xff]  ;;  %v51_v39 = vld [vmem:[%s5201_s0 + $0xc8] sm:$0xff] }
   0xa   :  { %v3431_v35 = vmax.f32 %v48_v32, %v49_v33  ;;  %v53_v37 = vld [vmem:[%s5201_s0 + $0xd8] sm:$0xff]  ;;  %v3451_v41 = vmax.f32 %v50_v38, %v51_v39  ;;  %v56_v42 = vld [vmem:[%s5201_s0 + $0xf0] sm:$0xff]  ;;  %v54_v44 = vld [vmem:[%s5201_s0 + $0xe0] sm:$0xff] }
   0xb   :  { %v3447_v40 = vmax.f32 %v52_v36, %v53_v37  ;;  %v57_v43 = vld [vmem:[%s5201_s0 + $0xf8] sm:$0xff]  ;;  %v55_v45 = vld [vmem:[%s5201_s0 + $0xe8] sm:$0xff]  ;;  %s3258_s0 = smov 8   ;;  %vm372_vm4 = vmor %vm370_vm0, %vm371_vm1  ;;  %vm1897_vm0 = vcmask 261120   ;;  %vm2878_vm1 = vcmask 326656  }
   0xc   :  { %106 = vrot.lane.b32.xlu1 %v3367_v16, %s3256_s17  ;;  %v3467_v46 = vmax.f32 %v56_v42, %v57_v43  ;;  %v3471_v47 = vmax.f32 %v54_v44, %v55_v45  ;;  %vm374_vm5 = vmor %vm372_vm4, %vm373_vm2  ;;  %vm2883_vm2 = vcmask 392192   ;;  %vm2893_vm4 = vcmask 523264  }
   0xd   :  { %98 = vrot.lane.b32.xlu0 %v3371_v17, %s3256_s17  ;;  %vm3918_vm6 = vmor %vm374_vm5, %vm375_vm3  ;;  %vm2888_vm3 = vcmask 457728   ;;  %vm2899_vm5 = vcmask 588800  }
   0xe   :  { %5247 = vst [vmem:[#allocation2_spill] sm:$0xff] %v3467_v46  ;;  %5248 = vst [vmem:[#allocation3_spill] sm:$0xff] %v3471_v47 }
  0x10   :  { %100 = vrot.lane.b32.xlu1 %v3387_v22, %s3256_s17 }
  0x11   :  { %108 = vrot.lane.b32.xlu0 %v3391_v23, %s3256_s17 }
  0x14   :  { %102 = vrot.lane.b32.xlu1 %v3407_v28, %s3256_s17 }
  0x15   :  { %110 = vrot.lane.b32.xlu0 %v3417_v31, %s3256_s17 }
  0x18   :  { %104 = vrot.lane.b32.xlu1 %v3427_v34, %s3256_s17 }
  0x19   :  { %112 = vrot.lane.b32.xlu0 %v3431_v35, %s3256_s17 }
  0x1c   :  { %116 = vrot.lane.b32.xlu1 %v3447_v40, %s3256_s17 }
  0x1d   :  { %114 = vrot.lane.b32.xlu0 %v3451_v41, %s3256_s17 }
  0x20   :  { %120 = vrot.lane.b32.xlu1 %v3467_v46, %s3256_s17 }
  0x21   :  { %118 = vrot.lane.b32.xlu0 %v3471_v47, %s3256_s17  ;;  %s3259_s17 = smov 12  }
  0x76   :  { %v95_v54 = vpop.permute.xlu1 %94 }
  0x77   :  { %v91_v55 = vpop.permute.xlu0 %90  ;;  %v140_v60 = vmax.f32 %v3326_v3, %v95_v54 }
  0x78   :  { %v138_v56 = vmax.f32 %v3337_v7, %v91_v55 }
  0x79   :  { %v198_v6 = vcombine.high %v140_v60, %v140_v60  ;;  %v3502_v7 = vrot.slane %v140_v60, %v3480_v53 }
  0x7a   :  { %v166_v57 = vcombine.high %v138_v56, %v138_v56  ;;  %v3484_v58 = vrot.slane %v138_v56, %v3480_v53  ;;  %v97_v59 = vpop.permute.xlu1 %96 }
  0x7b   :  { %v93_v61 = vpop.permute.xlu0 %92  ;;  %v141_v0 = vmax.f32 %v3347_v10, %v97_v59  ;;  %v3531_v24 = vrot.slane %v198_v6, %v3480_v53  ;;  %v3539_v26 = vcombine.high %v3502_v7, %v3502_v7 }
  0x7c   :  { %5250 = vst [vmem:[#allocation5_spill] sm:$0xff] %v3484_v58  ;;  %v3488_v62 = vrot.slane %v166_v57, %v3480_v53  ;;  %v3492_v63 = vcombine.high %v3484_v58, %v3484_v58  ;;  %v139_v1 = vmax.f32 %v3351_v11, %v93_v61 }
  0x7d   :  { %v3510_v11 = vrot.slane %v141_v0, %v3480_v53  ;;  %v969_v36 = vcombine.low %v3539_v26, %v3531_v24  ;;  %v627_v49 = vcombine.low %v3502_v7, %v3539_v26 }
  0x7e   :  { %5251 = vst [vmem:[#allocation6_spill] sm:$0xff] %v3488_v62  ;;  %5252 = vst [vmem:[#allocation7_spill] sm:$0xff] %v3492_v63  ;;  %v182_v4 = vcombine.high %v139_v1, %v139_v1  ;;  %v3499_v5 = vrot.slane %v139_v1, %v3480_v53  ;;  %v107_v3 = vpop.permute.xlu1 %106  ;;  %v951_v10 = vcombine.low %v3492_v63, %v3488_v62 }
  0x7f   :  { %v3505_v8 = vmax.f32 %v3367_v16, %v107_v3  ;;  %v99_v9 = vpop.permute.xlu0 %98  ;;  %v3545_v30 = vcombine.high %v3510_v11, %v3510_v11  ;;  %v3578_v59 = vrot.slane %v969_v36, %v3480_v53  ;;  %v643_v61 = vcombine.low %v3531_v24, %v3510_v11 }
  0x80   :  { %5253 = vst [vmem:[#allocation8_spill] sm:$0xff] %v3499_v5  ;;  %v3513_v12 = vrot.slane %v182_v4, %v3480_v53  ;;  %v3043_v13 = vcombine.high %v3488_v62, %v3499_v5  ;;  %v3519_v14 = vcombine.high %v3499_v5, %v3499_v5  ;;  %v142_v16 = vmax.f32 %v3371_v17, %v99_v9 }
  0x81   :  { %v3523_v15 = vrot.slane %v3505_v8, %v3480_v53  ;;  %v959_v19 = vrot.slane %v951_v10, %v3480_v53  ;;  %v214_v17 = vcombine.high %v141_v0, %v141_v0  ;;  %v1148_v54 = vcombine.low %v3510_v11, %v3545_v30 }
  0x82   :  { %v101_v18 = vpop.permute.xlu1 %100  ;;  %v966_v20 = vrot.slane %v3043_v13, %v3480_v53  ;;  %v1131_v21 = vcombine.low %v3499_v5, %v3519_v14  ;;  %v1132_v29 = vcombine.low %v3513_v12, %v3502_v7  ;;  %v230_v33 = vcombine.high %v142_v16, %v142_v16 }
  0x83   :  { %5254 = vst [vmem:[#allocation9_spill] sm:$0xff] %v3523_v15  ;;  %v3535_v25 = vcombine.high %v3523_v15, %v3523_v15  ;;  %v3552_v37 = vrot.slane %v142_v16, %v3480_v53  ;;  %v143_v38 = vmax.f32 %v3387_v22, %v101_v18  ;;  %v109_v44 = vpop.permute.xlu0 %108  ;;  %v626_v45 = vcombine.low %v3519_v14, %v3513_v12 }
  0x84   :  { %v967_v27 = vcombine.low %v959_v19, %v966_v20  ;;  %v1139_v42 = vrot.slane %v1131_v21, %v3480_v53  ;;  %v1146_v43 = vrot.slane %v1132_v29, %v3480_v53  ;;  %v3049_v48 = vcombine.high %v3513_v12, %v3502_v7 }
  0x85   :  { %5255 = vst [vmem:[#allocation10_spill] sm:$0xff] %v3535_v25  ;;  %v3565_v22 = vrot.slane %v214_v17, %v3480_v53  ;;  %v3571_v55 = vrot.slane %v230_v33, %v3480_v53  ;;  %v3574_v56 = vrot.slane %v626_v45, %v3480_v53  ;;  %v246_v60 = vcombine.high %v143_v38, %v143_v38 }
  0x86   :  { %1104 = vrot.lane.b32.xlu1 %v967_v27, %s3258_s0  ;;  %v103_v39 = vpop.permute.xlu1 %102  ;;  %v1147_v51 = vcombine.low %v1139_v42, %v1146_v43  ;;  %v1466_v57 = vrot.slane %v3049_v48, %v3480_v53  ;;  %v3586_v0 = vcombine.high %v3552_v37, %v3552_v37  ;;  %v3589_v1 = vrot.slane %v143_v38, %v3480_v53 }
  0x87   :  { %v144_v50 = vmax.f32 %v3407_v28, %v103_v39  ;;  %5256 = vst [vmem:[#allocation11_spill] sm:$0xff] %v3574_v56  ;;  %v1155_v28 = vrot.slane %v1148_v54, %v3480_v53  ;;  %v111_v6 = vpop.permute.xlu0 %110  ;;  %v1157_v9 = vcombine.low %v3565_v22, %v3552_v37  ;;  %v3599_v16 = vrot.slane %v643_v61, %v3480_v53 }
  0x88   :  { %1252 = vrot.lane.b32.xlu0 %v1147_v51, %s3259_s17  ;;  %v1467_v4 = vcombine.low %v3574_v56, %v1466_v57  ;;  %v3603_v18 = vrot.slane %v627_v49, %v3480_v53  ;;  %v1002_v19 = vcombine.low %v3586_v0, %v3571_v55  ;;  %v3608_v20 = vrot.slane %v246_v60, %v3480_v53 }
  0x89   :  { %v3595_v10 = vrot.slane %v144_v50, %v3480_v53  ;;  %v1156_v13 = vcombine.low %v3578_v59, %v1155_v28  ;;  %5257 = vst [vmem:[#allocation12_spill] sm:$0xff] %v3599_v16  ;;  %v147_v21 = vmax.f32 %v3391_v23, %v109_v44  ;;  %v3044_v27 = vcombine.high %v3531_v24, %v3510_v11 }
  0x8a   :  { %v105_v3 = vpop.permute.xlu1 %104  ;;  %1564 = vrot.lane.b32.xlu1 %v1467_v4, %s3260_s22  ;;  %5258 = vst [vmem:[#allocation13_spill] sm:$0xff] %v3603_v18  ;;  %v1591_v29 = vcombine.low %v3603_v18, %v3599_v16  ;;  %v3620_v33 = vrot.slane %v1002_v19, %v3480_v53  ;;  %v1164_v36 = vrot.slane %v1157_v9, %v3480_v53 }
  0x8b   :  { %v3612_v17 = vmax.f32 %v3427_v34, %v105_v3  ;;  %v3625_v38 = vcombine.high %v3589_v1, %v3589_v1  ;;  %v499_v23 = vcombine.high %v144_v50, %v144_v50  ;;  %v3628_v34 = vrot.slane %v3044_v27, %v3480_v53  ;;  %v113_v44 = vpop.permute.xlu0 %112 }
  0x8c   :  { %1254 = vrot.lane.b32.xlu0 %v1156_v13, %s3259_s17  ;;  %v1167_v39 = vcombine.low %v3608_v20, %v3595_v10  ;;  %v148_v42 = vmax.f32 %v3417_v31, %v111_v6  ;;  %v1165_v43 = vcombine.low %v1164_v36, %v3620_v33  ;;  %v644_v48 = vcombine.low %v3545_v30, %v3565_v22 }
  0x8d   :  { %v1166_v45 = vcombine.low %v3589_v1, %v3625_v38  ;;  %v278_v49 = vcombine.high %v147_v21, %v147_v21  ;;  %v660_v51 = vcombine.low %v3552_v37, %v3586_v0  ;;  %v3644_v54 = vrot.slane %v3612_v17, %v3480_v53 }
  0x8e   :  { %1648 = vrot.lane.b32.xlu1 %v1591_v29, %s3261_s23  ;;  %v1181_v50 = vrot.slane %v1167_v39, %v3480_v53  ;;  %v1759_v31 = vcombine.low %v3578_v59, %v3628_v34  ;;  %v677_v60 = vcombine.low %v3625_v38, %v3608_v20  ;;  %v3653_v28 = vrot.slane %v147_v21, %v3480_v53 }
  0x8f   :  { %5259 = vst [vmem:[#allocation14_spill] sm:$0xff] %v3644_v54  ;;  %v1174_v57 = vrot.slane %v1166_v45, %v3480_v53  ;;  %v3656_v61 = vrot.slane %v660_v51, %v3480_v53  ;;  %v3051_v4 = vcombine.high %v3608_v20, %v3595_v10  ;;  %v3045_v3 = vcombine.high %v3571_v55, %v3589_v1  ;;  %v115_v39 = vpop.permute.xlu0 %114 }
  0x90   :  { %1256 = vrot.lane.b32.xlu0 %v1165_v43, %s3259_s17  ;;  %v3663_v6 = vrot.slane %v499_v23, %v3480_v53  ;;  %v294_v9 = vcombine.high %v148_v42, %v148_v42  ;;  %v3667_v19 = vrot.slane %v644_v48, %v3480_v53  ;;  %v3670_v21 = vrot.slane %v148_v42, %v3480_v53 }
  0x91   :  { %5260 = vst [vmem:[#allocation15_spill] sm:$0xff] %v3656_v61  ;;  %v1182_v13 = vcombine.low %v1174_v57, %v1181_v50  ;;  %v149_v27 = vmax.f32 %v3431_v35, %v113_v44  ;;  %v3674_v29 = vrot.slane %v677_v60, %v3480_v53  ;;  %v1501_v36 = vrot.slane %v3051_v4, %v3480_v53 }
  0x92   :  { %1800 = vrot.lane.b32.xlu1 %v1759_v31, %s3262_s24  ;;  %5261 = vst [vmem:[#allocation16_spill] sm:$0xff] %v3667_v19  ;;  %5262 = vst [vmem:[#allocation17_spill] sm:$0xff] %v3670_v21  ;;  %v1592_v23 = vcombine.low %v3667_v19, %v3656_v61  ;;  %v3681_v43 = vrot.slane %v3045_v3, %v3480_v53  ;;  %v3685_v42 = vcombine.high %v3595_v10, %v3595_v10 }
  0x93   :  { %5263 = vst [vmem:[#allocation18_spill] sm:$0xff] %v3674_v29  ;;  %v1595_v35 = vcombine.low %v3663_v6, %v3644_v54  ;;  %v3690_v44 = vrot.slane %v278_v49, %v3480_v53  ;;  %v1502_v45 = vcombine.low %v3674_v29, %v1501_v36  ;;  %v661_v48 = vcombine.low %v3571_v55, %v3589_v1 }
  0x94   :  { %1258 = vrot.lane.b32.xlu0 %v1182_v13, %s3259_s17  ;;  %v1594_v50 = vcombine.low %v3595_v10, %v3685_v42  ;;  %v3701_v31 = vcombine.high %v3653_v28, %v3653_v28  ;;  %v1183_v49 = vcombine.low %v3685_v42, %v3663_v6  ;;  %v3706_v57 = vrot.slane %v294_v9, %v3480_v53 }
  0x95   :  { %v1609_v51 = vrot.slane %v1595_v35, %v3480_v53  ;;  %v310_v60 = vcombine.high %v149_v27, %v149_v27  ;;  %v150_v4 = vmax.f32 %v3451_v41, %v115_v39  ;;  %v3711_v3 = vcombine.high %v3670_v21, %v3670_v21 }
  0x96   :  { %1650 = vrot.lane.b32.xlu1 %v1592_v23, %s3261_s23  ;;  %v1018_v13 = vcombine.low %v3620_v33, %v3681_v43  ;;  %v1602_v36 = vrot.slane %v1594_v50, %v3480_v53  ;;  %v1184_v23 = vcombine.low %v3653_v28, %v3701_v31  ;;  %v1200_v9 = vcombine.low %v3690_v44, %v3670_v21 }
  0x97   :  { %v3722_v35 = vrot.slane %v149_v27, %v3480_v53  ;;  %v3725_v41 = vrot.slane %v661_v48, %v3480_v53  ;;  %v1053_v39 = vcombine.low %v3711_v3, %v3706_v57  ;;  %v1191_v50 = vrot.slane %v1183_v49, %v3480_v53 }
  0x98   :  { %1570 = vrot.lane.b32.xlu0 %v1502_v45, %s3260_s22  ;;  %v117_v45 = vpop.permute.xlu1 %116  ;;  %v1610_v32 = vcombine.low %v1602_v36, %v1609_v51  ;;  %v1198_v2 = vrot.slane %v1184_v23, %v3480_v53  ;;  %v3055_v52 = vcombine.high %v3663_v6, %v3644_v54  ;;  %v555_v27 = vcombine.high %v3612_v17, %v3612_v17 }
  0x99   :  { %5264 = vst [vmem:[#allocation19_spill] sm:$0xff] %v3722_v35  ;;  %5265 = vst [vmem:[#allocation20_spill] sm:$0xff] %v3725_v41  ;;  %v3737_v48 = vrot.slane %v310_v60, %v3480_v53  ;;  %v3740_v61 = vrot.slane %v150_v4, %v3480_v53  ;;  %v1593_v51 = vcombine.low %v3725_v41, %v3674_v29 }
  0x9a   :  { %1110 = vrot.lane.b32.xlu1 %v1018_v13, %s3258_s0  ;;  %v3047_v13 = vcombine.high %v3706_v57, %v3722_v35  ;;  %v3748_v49 = vrot.slane %v1053_v39, %v3480_v53  ;;  %v1207_v36 = vrot.slane %v1200_v9, %v3480_v53  ;;  %v326_v60 = vcombine.high %v150_v4, %v150_v4 }
  0x9b   :  { %5266 = vst [vmem:[#allocation21_spill] sm:$0xff] %v3740_v61  ;;  %v3753_v23 = vmax.f32 %v3447_v40, %v117_v45  ;;  %v3757_v16 = vcombine.high %v3722_v35, %v3722_v35  ;;  %v1199_v9 = vcombine.low %v1191_v50, %v1198_v2  ;;  %v1769_v17 = vrot.slane %v3055_v52, %v3480_v53 }
  0x9c   :  { %1654 = vrot.lane.b32.xlu0 %v1610_v32, %s3261_s23  ;;  %5267 = vst [vmem:[#allocation22_spill] sm:$0xff] %v3748_v49  ;;  %v3053_v32 = vcombine.high %v3737_v48, %v3740_v61  ;;  %v262_v40 = vcombine.high %v3505_v8, %v3505_v8  ;;  %v3768_v4 = vrot.slane %v555_v27, %v3480_v53 }
  0x9d   :  { %5268 = vst [vmem:[#allocation23_spill] sm:$0xff] %v3753_v23  ;;  %5269 = vst [vmem:[#allocation24_spill] sm:$0xff] %v3757_v16  ;;  %v3771_v45 = vrot.slane %v3047_v13, %v3480_v53  ;;  %v728_v41 = vcombine.low %v3757_v16, %v3737_v48  ;;  %v1208_v2 = vcombine.low %v1207_v36, %v3748_v49 }
  0x9e   :  { %1652 = vrot.lane.b32.xlu1 %v1593_v51, %s3261_s23  ;;  %5270 = vst [vmem:[#allocation25_spill] sm:$0xff] %v3768_v4  ;;  %v712_v52 = vcombine.low %v3706_v57, %v3722_v35  ;;  %v3781_v8 = vcombine.high %v3644_v54, %v3644_v54  ;;  %v3785_v27 = vcombine.high %v3513_v12, %v3513_v12 }
  0x9f   :  { %v3788_v13 = vrot.slane %v326_v60, %v3480_v53  ;;  %v3792_v51 = vrot.slane %v3753_v23, %v3480_v53  ;;  %v1536_v36 = vrot.slane %v3053_v32, %v3480_v53  ;;  %v1770_v29 = vcombine.low %v1191_v50, %v1769_v17 }
  0xa0   :  { %1260 = vrot.lane.b32.xlu0 %v1199_v9, %s3259_s17  ;;  %5271 = vst [vmem:[#allocation26_spill] sm:$0xff] %v3781_v8  ;;  %v711_v9 = vcombine.low %v3670_v21, %v3711_v3  ;;  %v1611_v39 = vcombine.low %v3781_v8, %v3768_v4  ;;  %v1209_v56 = vcombine.low %v3722_v35, %v3757_v16 }
  0xa1   :  { %5272 = vst [vmem:[#allocation27_spill] sm:$0xff] %v3792_v51  ;;  %v1210_v60 = vcombine.low %v3737_v48, %v3740_v61  ;;  %v1069_v18 = vcombine.low %v3748_v49, %v3771_v45  ;;  %v3807_v32 = vrot.slane %v728_v41, %v3480_v53  ;;  %v3813_v50 = vcombine.high %v3565_v22, %v3565_v22 }
  0xa2   :  { %1262 = vrot.lane.b32.xlu1 %v1208_v2, %s3259_s17  ;;  %v968_v2 = vcombine.low %v3513_v12, %v3785_v27  ;;  %v3817_v17 = vrot.slane %v712_v52, %v3480_v53  ;;  %v3821_v46 = vcombine.high %v3740_v61, %v3740_v61  ;;  %v745_v41 = vcombine.low %v3788_v13, %v3792_v51 }
  0xa3   :  { %5273 = vst [vmem:[#allocation28_spill] sm:$0xff] %v3807_v32  ;;  %v3827_v49 = vcombine.high %v3531_v24, %v3531_v24  ;;  %v1537_v47 = vcombine.low %v3807_v32, %v1536_v36  ;;  %v3831_v23 = vrot.slane %v711_v9, %v3480_v53  ;;  %v3837_v52 = vcombine.high %v3571_v55, %v3571_v55 }
  0xa4   :  { %1806 = vrot.lane.b32.xlu0 %v1770_v29, %s3262_s24  ;;  %5274 = vst [vmem:[#allocation29_spill] sm:$0xff] %v3817_v17  ;;  %v986_v29 = vcombine.low %v3565_v22, %v3813_v50  ;;  %v1618_v51 = vrot.slane %v1611_v39, %v3480_v53  ;;  %v1217_v4 = vrot.slane %v1209_v56, %v3480_v53 }
  0xa5   :  { %5275 = vst [vmem:[#allocation30_spill] sm:$0xff] %v3831_v23  ;;  %v1224_v16 = vrot.slane %v1210_v60, %v3480_v53  ;;  %v729_v36 = vcombine.low %v3740_v61, %v3821_v46  ;;  %v3846_v9 = vrot.slane %v262_v40, %v3480_v53  ;;  %v976_v54 = vrot.slane %v968_v2, %v3480_v53 }
  0xa6   :  { %1116 = vrot.lane.b32.xlu1 %v1069_v18, %s3258_s0  ;;  %v1620_v18 = vcombine.low %v3817_v17, %v3807_v32  ;;  %v3856_v39 = vrot.slane %v745_v41, %v3480_v53  ;;  %v1468_v40 = vcombine.low %v3531_v24, %v3827_v49  ;;  %v3861_v60 = vrot.slane %v986_v29, %v3480_v53 }
  0xa7   :  { %v3050_v35 = vcombine.high %v3565_v22, %v3552_v37  ;;  %v3869_v2 = vcombine.high %v3690_v44, %v3690_v44  ;;  %v1619_v41 = vcombine.low %v1618_v51, %v3831_v23  ;;  %v1225_v8 = vcombine.low %v1217_v4, %v1224_v16 }
  0xa8   :  { %1576 = vrot.lane.b32.xlu0 %v1537_v47, %s3260_s22  ;;  %5276 = vst [vmem:[#allocation31_spill] sm:$0xff] %v3856_v39  ;;  %v1478_v47 = vcombine.low %v3571_v55, %v3837_v52  ;;  %v3874_v56 = vrot.slane %v729_v36, %v3480_v53  ;;  %v984_v32 = vcombine.low %v976_v54, %v3578_v59  ;;  %v5279_v17 = vrot.slane %v3492_v63, 7 }
  0xa9   :  { %5277 = vst [vmem:[#allocation32_spill] sm:$0xff] %v3869_v2  ;;  %v1475_v4 = vrot.slane %v1468_v40, %v3480_v53  ;;  %v3890_v51 = vcombine.high %v3608_v20, %v3608_v20  ;;  %v358_v59 = vcombine.high %v3488_v62, %v3488_v62  ;;  %v1001_v54 = vcombine.low %v3628_v34, %v3861_v60 }
  0xaa   :  { %1658 = vrot.lane.b32.xlu1 %v1620_v18, %s3261_s23  ;;  %5278 = vst [vmem:[#allocation33_spill] sm:$0xff] %v3874_v56  ;;  %v3046_v18 = vcombine.high %v3846_v9, %v3653_v28  ;;  %v1621_v16 = vcombine.low %v3874_v56, %v3856_v39  ;;  %v1485_v36 = vrot.slane %v3050_v35, %v3480_v53  ;;  %v381_v39 = vrot.slane %v5279_v17, 2 }
  0xab   :  { %v1492_v61 = vrot.slane %v1478_v47, %v3480_v53  ;;  %v1760_v40 = vcombine.low %v3861_v60, %v3620_v33  ;;  %v382_v34 = vrot.slane %v3488_v62, 7  ;;  %v1476_v35 = vcombine.low %v1475_v4, %v3667_v19 }
  0xac   :  { %1656 = vrot.lane.b32.xlu0 %v1619_v41, %s3261_s23  ;;  %v1037_v41 = vcombine.low %v3690_v44, %v3869_v2  ;;  %v1044_v47 = vrot.slane %v3046_v18, %v3480_v53  ;;  %v3912_v56 = vcombine.high %v3706_v57, %v3706_v57  ;;  %v385_v23 = vrot.slane %v358_v59, 7 }
  0xad   :  { %v1019_v33 = vcombine.low %v3608_v20, %v3890_v51  ;;  %v384_v17 = vrot.slane %v382_v34, 2  ;;  %v3028_v60 = vrot.slane %v3499_v5, 9  ;;  %v389_v18 = vrot.slane %v3519_v14, 7 }
  0xae   :  { %1264 = vrot.lane.b32.xlu1 %v1225_v8, %s3259_s17  ;;  %v1051_v4 = vrot.slane %v1037_v41, %v3480_v53  ;;  %v1020_v59 = vcombine.low %v3535_v25, %v3846_v9  ;;  %v392_v29 = vrot.slane %v3513_v12, 7  ;;  %v3937_v62 = vcombine.high %v3737_v48, %v3737_v48 }
  0xaf   :  { %v3933_v19 = vsel %vm3918_vm6, %v3028_v60, %v389_v18  ;;  %v391_v14 = vrot.slane %v389_v18, 2  ;;  %v399_v41 = vrot.slane %v3539_v26, 7  ;;  %v3052_v5 = vcombine.high %v3690_v44, %v3670_v21 }
  0xb0   :  { %1106 = vrot.lane.b32.xlu0 %v984_v32, %s3258_s0  ;;  %v383_v32 = vsel %vm3918_vm6, %v381_v39, %v382_v34  ;;  %v1513_v39 = vcombine.low %v3706_v57, %v3912_v56  ;;  %v5282_v12 = vrot.slane %v3492_v63, 7  ;;  %v386_v60 = vsel %vm3918_vm6, %v384_v17, %v385_v23 }
  0xb1   :  { %v772_v26 = vcombine.low %v386_v60, %v3933_v19  ;;  %v394_v15 = vrot.slane %v392_v29, 2  ;;  %v401_v25 = vrot.slane %v399_v41, 2  ;;  %v1493_v2 = vcombine.low %v1485_v36, %v1492_v61 }
  0xb2   :  { %1660 = vrot.lane.b32.xlu1 %v1621_v16, %s3261_s23  ;;  %v5283_v16 = vrot.slane %v3484_v58, 9  ;;  %v435_v21 = vrot.slane %v3890_v51, 7  ;;  %v402_v63 = vrot.slane %v3531_v24, 7  ;;  %v3958_v58 = vcombine.high %v3663_v6, %v3663_v6 }
  0xb3   :  { %v1070_v23 = vcombine.low %v3737_v48, %v3937_v62  ;;  %v5284_v17 = vrot.slane %v3785_v27, 7  ;;  %v409_v24 = vrot.slane %v3545_v30, 7  ;;  %v1052_v36 = vcombine.low %v1044_v47, %v1051_v4 }
  0xb4   :  { %v380_v34 = vsel %vm3918_vm6, %v5283_v16, %v5282_v12  ;;  %1108 = vrot.lane.b32.xlu0 %v1001_v54, %s3258_s0  ;;  %v3965_v54 = vsel %vm3918_vm6, %v391_v14, %v392_v29  ;;  %v1520_v12 = vrot.slane %v3052_v5, %v3480_v53  ;;  %v1527_v29 = vrot.slane %v1513_v39, %v3480_v53 }
  0xb5   :  { %v771_v18 = vcombine.low %v380_v34, %v383_v32  ;;  %v3971_v61 = vsel %vm3918_vm6, %v394_v15, %v5284_v17  ;;  %v1027_v32 = vrot.slane %v1019_v33, %v3480_v53  ;;  %v786_v27 = vrot.slane %v772_v26, %v3480_v53 }
  0xb6   :  { %1566 = vrot.lane.b32.xlu1 %v1476_v35, %s3260_s22  ;;  %v1034_v35 = vrot.slane %v1020_v59, %v3480_v53  ;;  %v403_v15 = vsel %vm3918_vm6, %v401_v25, %v402_v63  ;;  %v788_v30 = vcombine.low %v3965_v54, %v3971_v61  ;;  %v1503_v47 = vcombine.low %v3663_v6, %v3958_v58 }
  0xb7   :  { %v779_v14 = vrot.slane %v771_v18, %v3480_v53  ;;  %v404_v33 = vrot.slane %v402_v63, 2  ;;  %v411_v4 = vrot.slane %v409_v24, 2  ;;  %v3989_v5 = vrot.slane %v1070_v23, %v3480_v53 }
  0xb8   :  { %1568 = vrot.lane.b32.xlu0 %v1493_v2, %s3260_s22  ;;  %v5285_v2 = vrot.slane %v3502_v7, 9  ;;  %v3030_v25 = vrot.slane %v3510_v11, 9  ;;  %v412_v39 = vrot.slane %v3565_v22, 7  ;;  %v1761_v16 = vcombine.low %v3681_v43, %v1027_v32 }
  0xb9   :  { %v1035_v34 = vcombine.low %v1027_v32, %v1034_v35  ;;  %v1528_v60 = vcombine.low %v1520_v12, %v1527_v29  ;;  %v787_v7 = vcombine.low %v779_v14, %v786_v27  ;;  %v3031_v18 = vrot.slane %v3552_v37, 9 }
  0xba   :  { %1802 = vrot.lane.b32.xlu1 %v1760_v40, %s3262_s24  ;;  %v3995_v59 = vsel %vm3918_vm6, %v5285_v2, %v399_v41  ;;  %v695_v40 = vcombine.low %v3701_v31, %v3690_v44  ;;  %v413_v41 = vsel %vm3918_vm6, %v411_v4, %v412_v39  ;;  %v796_v11 = vrot.slane %v788_v30, %v3480_v53 }
  0xbb   :  { %v789_v63 = vcombine.low %v3995_v59, %v403_v15  ;;  %v1510_v22 = vrot.slane %v1503_v47, %v3480_v53  ;;  %v5286_v43 = vrot.slane %v3827_v49, 7  ;;  %v1071_v23 = vcombine.low %v3821_v46, %v3788_v13 }
  0xbc   :  { %1114 = vrot.lane.b32.xlu0 %v1052_v36, %s3258_s0  ;;  %v1780_v17 = vcombine.low %v3771_v45, %v3989_v5  ;;  %v4022_v37 = vsel %vm3918_vm6, %v3030_v25, %v409_v24  ;;  %v414_v36 = vrot.slane %v412_v39, 2  ;;  %v419_v32 = vrot.slane %v3586_v0, 7 }
  0xbd   :  { %v4013_v26 = vsel %vm3918_vm6, %v404_v33, %v5286_v43  ;;  %v4026_v49 = vrot.slane %v789_v63, %v3480_v53  ;;  %v4029_v35 = vrot.slane %v695_v40, %v3480_v53  ;;  %v1297_v12 = vcombine.low %v4022_v37, %v413_v41 }
  0xbe   :  { %1804 = vrot.lane.b32.xlu1 %v1761_v16, %s3262_s24  ;;  %v1279_v29 = vcombine.low %v3933_v19, %v3965_v54  ;;  %v1296_v45 = vcombine.low %v403_v15, %v4013_v26  ;;  %v1280_v24 = vcombine.low %v3971_v61, %v3995_v59  ;;  %v420_v0 = vsel %vm3918_vm6, %v3031_v18, %v419_v32 }
  0xbf   :  { %v421_v14 = vrot.slane %v419_v32, 2  ;;  %v804_v27 = vcombine.low %v796_v11, %v4026_v49  ;;  %v1511_v30 = vcombine.low %v1510_v22, %v4029_v35  ;;  %v4043_v47 = vrot.slane %v1071_v23, %v3480_v53 }
  0xc0   :  { %1112 = vrot.lane.b32.xlu0 %v1035_v34, %s3258_s0  ;;  %v422_v19 = vrot.slane %v3571_v55, 7  ;;  %v5287_v54 = vrot.slane %v3813_v50, 7  ;;  %v3032_v15 = vrot.slane %v3589_v1, 9  ;;  %v429_v33 = vrot.slane %v3625_v38, 7 }
  0xc1   :  { %v432_v4 = vrot.slane %v3608_v20, 7  ;;  %v1311_v2 = vrot.slane %v1297_v12, %v3480_v53  ;;  %v1304_v50 = vrot.slane %v1296_v45, %v3480_v53  ;;  %v5288_v20 = vrot.slane %v3837_v52, 7 }
  0xc2   :  { %1574 = vrot.lane.b32.xlu1 %v1528_v60, %s3260_s22  ;;  %v416_v61 = vsel %vm3918_vm6, %v414_v36, %v5287_v54  ;;  %v423_v59 = vsel %vm3918_vm6, %v421_v14, %v422_v19  ;;  %v424_v25 = vrot.slane %v422_v19, 2  ;;  %v4061_v39 = vsel %vm3918_vm6, %v3032_v15, %v429_v33 }
  0xc3   :  { %v1313_v55 = vcombine.low %v416_v61, %v420_v0  ;;  %v822_v1 = vcombine.low %v420_v0, %v423_v59  ;;  %v431_v38 = vrot.slane %v429_v33, 2  ;;  %v806_v16 = vcombine.low %v413_v41, %v416_v61 }
  0xc4   :  { %924 = vrot.lane.b32.xlu0 %v787_v7, %s3263_s25  ;;  %v426_v34 = vsel %vm3918_vm6, %v424_v25, %v5288_v20  ;;  %v434_v63 = vrot.slane %v432_v4, 2  ;;  %v364_v40 = vcombine.high %v3846_v9, %v3846_v9  ;;  %v442_v11 = vrot.slane %v3846_v9, 7 }
  0xc5   :  { %v1314_v60 = vcombine.low %v423_v59, %v426_v34  ;;  %v823_v7 = vcombine.low %v426_v34, %v4061_v39  ;;  %v433_v18 = vsel %vm3918_vm6, %v431_v38, %v432_v4  ;;  %v1312_v41 = vcombine.low %v1304_v50, %v1311_v2 }
  0xc6   :  { %1810 = vrot.lane.b32.xlu1 %v1780_v17, %s3262_s24  ;;  %v805_v52 = vcombine.low %v4013_v26, %v4022_v37  ;;  %v1321_v22 = vrot.slane %v1313_v55, %v3480_v53  ;;  %v436_v43 = vsel %vm3918_vm6, %v434_v63, %v435_v21  ;;  %v4084_v17 = vrot.slane %v822_v1, %v3480_v53  ;;  %v5291_v1 = vld [vmem:[#allocation26_spill] sm:$0xff]  ;;  %v5292_v63 = vld [vmem:[#allocation32_spill] sm:$0xff] }
  0xc7   :  { %v1328_v23 = vrot.slane %v1314_v60, %v3480_v53  ;;  %v4087_v36 = vrot.slane %v823_v7, %v3480_v53  ;;  %v839_v32 = vcombine.low %v433_v18, %v436_v43  ;;  %v4090_v26 = vrot.slane %v806_v16, %v3480_v53 }
  0xc8   :  { %926 = vrot.lane.b32.xlu0 %v804_v27, %s3263_s25  ;;  %v445_v37 = vrot.slane %v364_v40, 7  ;;  %v449_v51 = vrot.slane %v3701_v31, 7  ;;  %v452_v12 = vrot.slane %v3690_v44, 7  ;;  %v444_v14 = vrot.slane %v442_v11, 2 }
  0xc9   :  { %v1329_v21 = vcombine.low %v1321_v22, %v1328_v23  ;;  %v838_v45 = vcombine.low %v4084_v17, %v4087_v36  ;;  %v4098_v0 = vrot.slane %v839_v32, %v3480_v53  ;;  %v1086_v27 = vcombine.low %v3989_v5, %v4043_v47 }
  0xca   :  { %1572 = vrot.lane.b32.xlu1 %v1511_v30, %s3260_s22  ;;  %v1287_v19 = vrot.slane %v1279_v29, %v3480_v53  ;;  %v1294_v31 = vrot.slane %v1280_v24, %v3480_v53  ;;  %v3034_v44 = vrot.slane %v3653_v28, 9  ;;  %v813_v30 = vrot.slane %v805_v52, %v3480_v53 }
  0xcb   :  { %v1677_v54 = vcombine.low %v4087_v36, %v4098_v0  ;;  %v462_v61 = vrot.slane %v3706_v57, 7  ;;  %v3039_v15 = vrot.slane %v3595_v10, 9  ;;  %v451_v33 = vrot.slane %v449_v51, 2  ;;  %v5289_v57 = vld [vmem:[#allocation17_spill] sm:$0xff] }
  0xcc   :  { %1434 = vrot.lane.b32.xlu0 %v1312_v41, %s3264_s26  ;;  %v454_v5 = vrot.slane %v452_v12, 2  ;;  %v459_v29 = vrot.slane %v3711_v3, 7  ;;  %v535_v24 = vrot.slane %v3685_v42, 7  ;;  %v465_v4 = vrot.slane %v3912_v56, 7  ;;  %v5290_v56 = vld [vmem:[#allocation14_spill] sm:$0xff] }
  0xcd   :  { %v821_v2 = vcombine.low %v813_v30, %v4090_v26  ;;  %v446_v59 = vsel %vm3918_vm6, %v444_v14, %v445_v37  ;;  %v1330_v25 = vcombine.low %v4061_v39, %v433_v18  ;;  %v4123_v10 = vsel %vm3918_vm6, %v3034_v44, %v449_v51  ;;  %v5294_v51 = vld [vmem:[#allocation19_spill] sm:$0xff]  ;;  %v5295_v14 = vld [vmem:[#allocation24_spill] sm:$0xff]  ;;  %v5296_v44 = vld [vmem:[#allocation10_spill] sm:$0xff] }
  0xce   :  { %1118 = vrot.lane.b32.xlu1 %v1086_v27, %s3258_s0  ;;  %v3035_v55 = vrot.slane %v5289_v57, 9  ;;  %v464_v3 = vrot.slane %v462_v61, 2  ;;  %v536_v42 = vsel %vm3918_vm6, %v3039_v15, %v535_v24  ;;  %v3041_v50 = vrot.slane %v5290_v56, 9 }
  0xcf   :  { %v591_v38 = vrot.slane %v5291_v1, 7  ;;  %v1295_v16 = vcombine.low %v1287_v19, %v1294_v31  ;;  %v1331_v20 = vcombine.low %v436_v43, %v536_v42  ;;  %v541_v39 = vrot.slane %v3958_v58, 7 }
  0xd0   :  { %928 = vrot.lane.b32.xlu0 %v821_v2, %s3263_s25  ;;  %v4134_v34 = vsel %vm3918_vm6, %v451_v33, %v452_v12  ;;  %v5293_v40 = vrot.slane %v5292_v63, 7  ;;  %v461_v7 = vrot.slane %v459_v29, 2  ;;  %v1675_v18 = vcombine.low %v4026_v49, %v813_v30 }
  0xd1   :  { %v856_v41 = vcombine.low %v446_v59, %v4123_v10  ;;  %v4144_v52 = vrot.slane %v1330_v25, %v3480_v53  ;;  %v4147_v58 = vrot.slane %v1331_v20, %v3480_v53  ;;  %v460_v22 = vsel %vm3918_vm6, %v3035_v55, %v459_v29  ;;  %v5298_v29 = vld [vmem:[#allocation25_spill] sm:$0xff] }
  0xd2   :  { %v456_v60 = vsel %vm3918_vm6, %v454_v5, %v5293_v40  ;;  %1432 = vrot.lane.b32.xlu1 %v1295_v16, %s3264_s26  ;;  %v466_v43 = vsel %vm3918_vm6, %v464_v3, %v465_v4  ;;  %v537_v23 = vrot.slane %v535_v24, 2  ;;  %v538_v32 = vrot.slane %v3663_v6, 7 }
  0xd3   :  { %v857_v49 = vcombine.low %v4134_v34, %v456_v60  ;;  %v1346_v37 = vcombine.low %v4144_v52, %v4147_v58  ;;  %v3036_v12 = vrot.slane %v5294_v51, 9  ;;  %v469_v27 = vrot.slane %v5295_v14, 7  ;;  %v5302_v52 = vld [vmem:[#allocation21_spill] sm:$0xff]  ;;  %v5303_v51 = vld [vmem:[#allocation23_spill] sm:$0xff] }
  0xd4   :  { %1436 = vrot.lane.b32.xlu0 %v1329_v21, %s3264_s26  ;;  %v463_v19 = vsel %vm3918_vm6, %v461_v7, %v462_v61  ;;  %v1364_v31 = vcombine.low %v456_v60, %v460_v22  ;;  %v5297_v30 = vrot.slane %v5296_v44, 7  ;;  %v4166_v6 = vsel %vm3918_vm6, %v537_v23, %v538_v32 }
  0xd5   :  { %v1365_v21 = vcombine.low %v463_v19, %v466_v43  ;;  %v540_v33 = vrot.slane %v538_v32, 2  ;;  %v592_v5 = vsel %vm3918_vm6, %v3041_v50, %v591_v38  ;;  %v1678_v61 = vcombine.low %v536_v42, %v4166_v6  ;;  %v5300_v50 = vld [vmem:[#allocation9_spill] sm:$0xff] }
  0xd6   :  { %v441_v15 = vrot.slane %v5297_v30, 2  ;;  %1732 = vrot.lane.b32.xlu1 %v1675_v18, %s3265_s27  ;;  %v4176_v24 = vcombine.high %v5298_v29, %v5298_v29  ;;  %v475_v4 = vrot.slane %v3937_v62, 7  ;;  %v1676_v2 = vcombine.low %v4090_v26, %v4084_v17 }
  0xd7   :  { %v472_v59 = vrot.slane %v3737_v48, 7  ;;  %v864_v25 = vrot.slane %v856_v41, %v3480_v53  ;;  %v871_v57 = vrot.slane %v857_v49, %v3480_v53  ;;  %v4187_v55 = vsel %vm3918_vm6, %v3036_v12, %v469_v27 }
  0xd8   :  { %930 = vrot.lane.b32.xlu0 %v838_v45, %s3263_s25  ;;  %v542_v3 = vsel %vm3918_vm6, %v540_v33, %v541_v39  ;;  %v443_v62 = vsel %vm3918_vm6, %v441_v15, %v442_v11  ;;  %v471_v48 = vrot.slane %v469_v27, 2  ;;  %v1372_v45 = vrot.slane %v1364_v31, %v3480_v53  ;;  %v5304_v31 = vld [vmem:[#allocation27_spill] sm:$0xff] }
  0xd9   :  { %v1679_v17 = vcombine.low %v542_v3, %v592_v5  ;;  %v474_v26 = vrot.slane %v472_v59, 2  ;;  %v1379_v42 = vrot.slane %v1365_v21, %v3480_v53  ;;  %v5299_v56 = vmov %v5297_v30  ;;  %v119_v5 = vpop.permute.xlu0 %118 }
  0xda   :  { %1734 = vrot.lane.b32.xlu1 %v1676_v2, %s3265_s27  ;;  %v5301_v16 = vrot.slane %v5300_v50, 9  ;;  %v1347_v39 = vcombine.low %v4166_v6, %v542_v3  ;;  %v874_v11 = vcombine.low %v466_v43, %v4187_v55  ;;  %v1686_v63 = vrot.slane %v1678_v61, %v3480_v53 }
  0xdb   :  { %v1693_v40 = vrot.slane %v1679_v17, %v3480_v53  ;;  %v479_v60 = vrot.slane %v3821_v46, 7  ;;  %v872_v7 = vcombine.low %v864_v25, %v871_v57  ;;  %v873_v41 = vcombine.low %v460_v22, %v463_v19 }
  0xdc   :  { %v440_v20 = vsel %vm3918_vm6, %v5301_v16, %v5299_v56  ;;  %1736 = vrot.lane.b32.xlu0 %v1677_v54, %s3265_s27  ;;  %v3037_v58 = vrot.slane %v5302_v52, 9  ;;  %v473_v43 = vsel %vm3918_vm6, %v471_v48, %v472_v59  ;;  %v476_v32 = vsel %vm3918_vm6, %v474_v26, %v475_v4 }
  0xdd   :  { %v840_v18 = vcombine.low %v440_v20, %v443_v62  ;;  %v1694_v23 = vcombine.low %v1686_v63, %v1693_v40  ;;  %v594_v49 = vrot.slane %v5298_v29, 7  ;;  %v1380_v46 = vcombine.low %v1372_v45, %v1379_v42 }
  0xde   :  { %934 = vrot.lane.b32.xlu1 %v872_v7, %s3263_s25  ;;  %v342_v36 = vcombine.high %v5303_v51, %v5303_v51  ;;  %v888_v54 = vrot.slane %v874_v11, %v3480_v53  ;;  %v481_v22 = vrot.slane %v479_v60, 2  ;;  %v482_v12 = vrot.slane %v3788_v13, 7 }
  0xdf   :  { %v854_v14 = vrot.slane %v840_v18, %v3480_v53  ;;  %v4227_v27 = vrot.slane %v873_v41, %v3480_v53  ;;  %v890_v19 = vcombine.low %v473_v43, %v476_v32  ;;  %v4231_v30 = vcombine.high %v5304_v31, %v5304_v31 }
  0xe0   :  { %1442 = vrot.lane.b32.xlu0 %v1380_v46, %s3264_s26  ;;  %v480_v15 = vsel %vm3918_vm6, %v3037_v58, %v479_v60  ;;  %v593_v6 = vrot.slane %v591_v38, 2  ;;  %v596_v21 = vrot.slane %v594_v49, 2  ;;  %v597_v33 = vrot.slane %v4176_v24, 7 }
  0xe1   :  { %v855_v61 = vcombine.low %v4098_v0, %v854_v14  ;;  %v1348_v4 = vcombine.low %v4123_v10, %v4134_v34  ;;  %v4243_v2 = vrot.slane %v342_v36, %v3480_v53  ;;  %v889_v59 = vcombine.low %v4227_v27, %v888_v54  ;;  %v5305_v34 = vld [vmem:[#allocation3_spill] sm:$0xff] }
  0xe2   :  { %1438 = vrot.lane.b32.xlu1 %v1346_v37, %s3264_s26  ;;  %v483_v1 = vsel %vm3918_vm6, %v481_v22, %v482_v12  ;;  %v4250_v38 = vcombine.high %v3788_v13, %v3788_v13  ;;  %v898_v37 = vrot.slane %v890_v19, %v3480_v53  ;;  %v1381_v0 = vcombine.low %v4187_v55, %v473_v43 }
  0xe3   :  { %v1382_v25 = vcombine.low %v476_v32, %v480_v15  ;;  %v489_v10 = vrot.slane %v4231_v30, 7  ;;  %v152_v57 = vmax.f32 %v5305_v34, %v119_v5  ;;  %v595_v3 = vsel %vm3918_vm6, %v593_v6, %v594_v49  ;;  %v121_v6 = vpop.permute.xlu1 %120 }
  0xe4   :  { %932 = vrot.lane.b32.xlu0 %v855_v61, %s3263_s25  ;;  %v598_v62 = vsel %vm3918_vm6, %v596_v21, %v597_v33  ;;  %v492_v17 = vrot.slane %v4243_v2, 7  ;;  %v1355_v48 = vrot.slane %v1347_v39, %v3480_v53  ;;  %v1362_v26 = vrot.slane %v1348_v4, %v3480_v53 }
  0xe5   :  { %v891_v55 = vcombine.low %v480_v15, %v483_v1  ;;  %v491_v45 = vrot.slane %v489_v10, 2  ;;  %v484_v42 = vrot.slane %v482_v12, 2  ;;  %v485_v56 = vrot.slane %v4250_v38, 7 }
  0xe6   :  { %936 = vrot.lane.b32.xlu1 %v889_v59, %s3263_s25  ;;  %v3038_v16 = vrot.slane %v5304_v31, 9  ;;  %v1704_v20 = vcombine.low %v888_v54, %v898_v37  ;;  %v1389_v11 = vrot.slane %v1381_v0, %v3480_v53  ;;  %v1396_v63 = vrot.slane %v1382_v25, %v3480_v53 }
  0xe7   :  { %v1695_v40 = vcombine.low %v595_v3, %v598_v62  ;;  %v4271_v60 = vrot.slane %v152_v57, %v3480_v53  ;;  %v4275_v39 = vsel %vm3918_vm6, %v491_v45, %v492_v17  ;;  %v1363_v7 = vcombine.low %v1355_v48, %v1362_v26 }
  0xe8   :  { %1738 = vrot.lane.b32.xlu0 %v1694_v23, %s3265_s27  ;;  %v905_v18 = vrot.slane %v891_v55, %v3480_v53  ;;  %v1226_v41 = vcombine.low %v5304_v31, %v4231_v30  ;;  %v486_v52 = vsel %vm3918_vm6, %v484_v42, %v485_v56  ;;  %v490_v58 = vsel %vm3918_vm6, %v3038_v16, %v489_v10 }
  0xe9   :  { %v1397_v23 = vcombine.low %v1389_v11, %v1396_v63  ;;  %v1702_v43 = vrot.slane %v1695_v40, %v3480_v53  ;;  %v1398_v32 = vcombine.low %v483_v1, %v486_v52  ;;  %v1399_v49 = vcombine.low %v490_v58, %v4275_v39  ;;  %v5307_v63 = vld [vmem:[#allocation22_spill] sm:$0xff] }
  0xea   :  { %1742 = vrot.lane.b32.xlu1 %v1704_v20, %s3265_s27  ;;  %v4290_v46 = vcombine.high %v4243_v2, %v4243_v2  ;;  %v4294_v51 = vcombine.high %v4271_v60, %v4271_v60  ;;  %v906_v36 = vcombine.low %v898_v37, %v905_v18  ;;  %v1233_v54 = vrot.slane %v1226_v41, %v3480_v53  ;;  %v5306_v37 = vld [vmem:[#allocation2_spill] sm:$0xff] }
  0xeb   :  { %v907_v22 = vcombine.low %v486_v52, %v490_v58  ;;  %v515_v12 = vcombine.high %v152_v57, %v152_v57  ;;  %v494_v14 = vrot.slane %v492_v17, 2  ;;  %v1703_v15 = vcombine.low %v1702_v43, %v4227_v27 }
  0xec   :  { %1440 = vrot.lane.b32.xlu0 %v1363_v7, %s3264_s26  ;;  %v495_v19 = vrot.slane %v4290_v46, 7  ;;  %v1406_v21 = vrot.slane %v1398_v32, %v3480_v53  ;;  %v1413_v33 = vrot.slane %v1399_v49, %v3480_v53  ;;  %v3048_v5 = vcombine.high %v3788_v13, %v5304_v31 }
  0xed   :  { %v545_v61 = vrot.slane %v4294_v51, 7  ;;  %v1234_v4 = vcombine.low %v4043_v47, %v1233_v54  ;;  %v915_v59 = vrot.slane %v907_v22, %v3480_v53  ;;  %v1771_v1 = vcombine.low %v5298_v29, %v4176_v24  ;;  %v1907_v22 = vld [vmem:[%s5202_s1] sm:$0xff]  ;;  %s3269_s1 = smov 120  }
  0xee   :  { %1444 = vrot.lane.b32.xlu1 %v1397_v23, %s3264_s26  ;;  %v4312_v27 = vrot.slane %v515_v12, %v3480_v53  ;;  %v153_v0 = vmax.f32 %v5306_v37, %v121_v6  ;;  %v746_v25 = vcombine.low %v4231_v30, %v4243_v2  ;;  %v4319_v31 = vsel %vm3918_vm6, %v494_v14, %v495_v19 }
  0xef   :  { %v1414_v10 = vcombine.low %v1406_v21, %v1413_v33  ;;  %v4323_v34 = vrot.slane %v3048_v5, %v3480_v53  ;;  %v1538_v29 = vcombine.low %v3788_v13, %v4250_v38  ;;  %v3040_v24 = vrot.slane %v4271_v60, 9 }
  0xf0   :  { %938 = vrot.lane.b32.xlu0 %v906_v36, %s3263_s25  ;;  %v547_v57 = vrot.slane %v545_v61, 2  ;;  %v548_v3 = vrot.slane %v4312_v27, 7  ;;  %v1705_v62 = vcombine.low %v905_v18, %v915_v59  ;;  %v1778_v17 = vrot.slane %v1771_v1, %v3480_v53 }
  0xf1   :  { %v908_v48 = vcombine.low %v4275_v39, %v4319_v31  ;;  %v571_v26 = vcombine.high %v153_v0, %v153_v0  ;;  %v4336_v55 = vrot.slane %v153_v0, %v3480_v53  ;;  %v4339_v13 = vrot.slane %v746_v25, %v3480_v53 }
  0xf2   :  { %1740 = vrot.lane.b32.xlu1 %v1703_v15, %s3265_s27  ;;  %v1781_v38 = vcombine.low %v4043_v47, %v4323_v34  ;;  %v1545_v45 = vrot.slane %v1538_v29, %v3480_v53  ;;  %v1622_v42 = vcombine.low %v4271_v60, %v4294_v51  ;;  %v4349_v56 = vcombine.high %v4312_v27, %v4312_v27 }
  0xf3   :  { %v1088_v20 = vcombine.low %v4243_v2, %v4290_v46  ;;  %v546_v11 = vsel %vm3918_vm6, %v3040_v24, %v545_v61  ;;  %v549_v47 = vsel %vm3918_vm6, %v547_v57, %v548_v3  ;;  %v1779_v40 = vcombine.low %v1778_v17, %v5307_v63 }
  0xf4   :  { %1266 = vrot.lane.b32.xlu0 %v1234_v4, %s3259_s17  ;;  %v922_v39 = vrot.slane %v908_v48, %v3480_v53  ;;  %v550_v7 = vrot.slane %v548_v3, 2  ;;  %v551_v18 = vrot.slane %v4349_v56, 7  ;;  %v4364_v41 = vrot.slane %v571_v26, %v3480_v53 }
  0xf5   :  { %v586_v52 = vcombine.high %v4336_v55, %v4336_v55  ;;  %v1546_v23 = vcombine.low %v1545_v45, %v4339_v13  ;;  %v1629_v43 = vrot.slane %v1622_v42, %v3480_v53  ;;  %v1706_v32 = vcombine.low %v546_v11, %v549_v47 }
  0xf6   :  { %1446 = vrot.lane.b32.xlu1 %v1414_v10, %s3264_s26  ;;  %v1102_v46 = vrot.slane %v1088_v20, %v3480_v53  ;;  %v1235_v36 = vcombine.low %v4243_v2, %v4271_v60  ;;  %v1236_v54 = vcombine.low %v4294_v51, %v4312_v27  ;;  %v923_v12 = vcombine.low %v915_v59, %v922_v39 }
  0xf7   :  { %v4386_v14 = vsel %vm3918_vm6, %v550_v7, %v551_v18  ;;  %v601_v19 = vrot.slane %v586_v52, 7  ;;  %v588_v15 = vcombine.high %v4364_v41, %v4364_v41  ;;  %v604_v6 = vrot.slane %v4364_v41, 7 }
  0xf8   :  { %v4330_v30 = vpop.permute.xlu1 %1104  ;;  %1744 = vrot.lane.b32.xlu0 %v1705_v62, %s3265_s27  ;;  %v3266_v21 = vmov 0.0   ;;  %v1630_v33 = vcombine.low %v4339_v13, %v1629_v43  ;;  %v1713_v5 = vrot.slane %v1706_v32, %v3480_v53  ;;  %v1103_v61 = vcombine.low %v4323_v34, %v1102_v46 }
  0xf9   :  { %3099 = vmatprep.subr.mxu0 %v3266_v21  ;;  %3147 = vmatprep.subr.mxu1 %v3266_v21  ;;  %v1243_v4 = vrot.slane %v1235_v36, %v3480_v53  ;;  %v1250_v1 = vrot.slane %v1236_v54, %v3480_v53  ;;  %v1415_v37 = vcombine.low %v4319_v31, %v546_v11  ;;  %v3042_v25 = vrot.slane %v4336_v55, 9 }
  0xfa   :  { %v4351_v16 = vpop.permute.xlu0 %1252  ;;  %1812 = vrot.lane.b32.xlu1 %v1781_v38, %s3262_s24  ;;  %3100 = vmatpush3.xpose.msk.msra.mxu0 %vm1908_vm7, %v1907_v22  ;;  %v1416_v0 = vcombine.low %v549_v47, %v4386_v14  ;;  %v607_v10 = vrot.slane %v588_v15, 7  ;;  %v603_v34 = vrot.slane %v601_v19, 2  ;;  %v606_v29 = vrot.slane %v604_v6, 2 }
  0xfb   :  { %3101 = vmatprep.mubr.msk.f32.mxu0 %vm3267_vm8, %v3266_v21  ;;  %3148 = vmatpush3.xpose.msk.msra.mxu1 %vm1908_vm7, %v1907_v22  ;;  %v1714_v57 = vcombine.low %v922_v39, %v1713_v5  ;;  %v1631_v3 = vcombine.low %v4312_v27, %v4336_v55  ;;  %v1632_v31 = vcombine.low %v586_v52, %v4364_v41 }
  0xfc   :  { %v4368_v58 = vpop.permute.xlu1 %1564  ;;  %1808 = vrot.lane.b32.xlu0 %v1779_v40, %s3262_s24  ;;  %3116 = vmatprep.mubr.msk.f32.mxu1 %vm3267_vm8, %v3266_v21  ;;  %v3054_v62 = vcombine.high %v4243_v2, %v4271_v60  ;;  %v1251_v48 = vcombine.low %v1243_v4, %v1250_v1  ;;  %v1423_v26 = vrot.slane %v1415_v37, %v3480_v53 }
  0xfd   :  { %v1430_v38 = vrot.slane %v1416_v0, %v3480_v53  ;;  %v1548_v45 = vcombine.low %v4312_v27, %v4349_v56  ;;  %v1782_v42 = vcombine.low %v1102_v46, %v1250_v1  ;;  %v602_v20 = vsel %vm3918_vm6, %v3042_v25, %v601_v19 }
  0xfe   :  { %v4373_v49 = vpop.permute.xlu0 %1254  ;;  %1578 = vrot.lane.b32.xlu1 %v1546_v23, %s3260_s22  ;;  %v605_v11 = vsel %vm3918_vm6, %v603_v34, %v604_v6  ;;  %v608_v2 = vsel %vm3918_vm6, %v606_v29, %v607_v10  ;;  %v1639_v47 = vrot.slane %v1631_v3, %v3480_v53  ;;  %v1646_v63 = vrot.slane %v1632_v31, %v3480_v53 }
  0xff   :  { %v3056_v56 = vcombine.high %v4312_v27, %v4336_v55  ;;  %v1784_v40 = vcombine.low %v4364_v41, %v588_v15  ;;  %v1555_v39 = vrot.slane %v3054_v62, %v3480_v53  ;;  %v1431_v18 = vcombine.low %v1423_v26, %v1430_v38  ;;  %v5308_v26 = vld [vmem:[#allocation8_spill] sm:$0xff]  ;;  %v5309_v38 = vld [vmem:[#allocation6_spill] sm:$0xff] }
 0x100   :  { %v4393_v51 = vpop.permute.xlu1 %1648  ;;  %940 = vrot.lane.b32.xlu0 %v923_v12, %s3263_s25  ;;  %v1562_v52 = vrot.slane %v1548_v45, %v3480_v53  ;;  %v1715_v23 = vcombine.low %v4386_v14, %v602_v20  ;;  %v1716_v43 = vcombine.low %v605_v11, %v608_v2  ;;  %v1647_v46 = vcombine.low %v1639_v47, %v1646_v63  ;;  %v5310_v2 = vld [vmem:[#allocation5_spill] sm:$0xff]  ;;  %v5311_v47 = vld [vmem:[#allocation7_spill] sm:$0xff] }
 0x101   :  { %v1791_v27 = vrot.slane %v3056_v56, %v3480_v53  ;;  %v1798_v55 = vrot.slane %v1784_v40, %v3480_v53  ;;  %v610_v45 = vcombine.low %v5309_v38, %v5308_v26  ;;  %v5312_v63 = vcombine.low %v5310_v2, %v5311_v47 }
 0x102   :  { %1662 = vrot.lane.b32.xlu1 %v1630_v33, %s3261_s23  ;;  %v4405_v59 = vpop.permute.xlu0 %1256  ;;  %v1563_v36 = vcombine.low %v1555_v39, %v1562_v52  ;;  %v1723_v54 = vrot.slane %v1715_v23, %v3480_v53  ;;  %v1730_v22 = vrot.slane %v1716_v43, %v3480_v53  ;;  %v5313_v39 = vld [vmem:[#allocation13_spill] sm:$0xff] }
 0x103   :  { %v1799_v14 = vcombine.low %v1791_v27, %v1798_v55  ;;  %v624_v20 = vrot.slane %v610_v45, %v3480_v53  ;;  %v617_v56 = vrot.slane %v5312_v63, %v3480_v53 }
 0x104   :  { %v4413_v24 = vpop.permute.xlu1 %1800  ;;  %1120 = vrot.lane.b32.xlu0 %v1103_v61, %s3258_s0  ;;  %v1731_v15 = vcombine.low %v1723_v54, %v1730_v22 }
 0x105   :  { %v625_v23 = vcombine.low %v617_v56, %v624_v20 }
 0x106   :  { %1746 = vrot.lane.b32.xlu1 %v1714_v57, %s3265_s27  ;;  %v4422_v17 = vpop.permute.xlu0 %1258 }
 0x108   :  { %v4434_v60 = vpop.permute.xlu1 %1650  ;;  %1268 = vrot.lane.b32.xlu0 %v1251_v48, %s3259_s17 }
 0x10a   :  { %1814 = vrot.lane.b32.xlu1 %v1782_v42, %s3262_s24  ;;  %v4444_v7 = vpop.permute.xlu0 %1570 }
 0x10c   :  { %v4448_v32 = vpop.permute.xlu1 %1110  ;;  %1448 = vrot.lane.b32.xlu0 %v1431_v18, %s3264_s26  ;;  %v5314_v18 = vld [vmem:[#allocation11_spill] sm:$0xff] }
 0x10d   :  { %v642_v52 = vcombine.low %v5314_v18, %v5313_v39 }
 0x10e   :  { %1664 = vrot.lane.b32.xlu1 %v1647_v46, %s3261_s23  ;;  %v4454_v41 = vpop.permute.xlu0 %1654 }
 0x110   :  { %v4458_v12 = vpop.permute.xlu1 %1652  ;;  %1580 = vrot.lane.b32.xlu0 %v1563_v36, %s3260_s22 }
 0x112   :  { %1816 = vrot.lane.b32.xlu1 %v1799_v14, %s3262_s24  ;;  %v4462_v19 = vpop.permute.xlu0 %1260  ;;  %v5315_v14 = vld [vmem:[#allocation16_spill] sm:$0xff] }
 0x114   :  { %v4464_v6 = vpop.permute.xlu1 %1262  ;;  %1748 = vrot.lane.b32.xlu0 %v1731_v15, %s3265_s27  ;;  %v5316_v15 = vld [vmem:[#allocation12_spill] sm:$0xff] }
 0x115   :  { %v659_v26 = vcombine.low %v5316_v15, %v5315_v14 }
 0x116   :  { %v4467_v33 = vpop.permute.xlu0 %1806 }
 0x118   :  { %v4469_v5 = vpop.permute.xlu1 %1116 }
 0x11a   :  { %v4471_v61 = vpop.permute.xlu0 %1576 }
 0x11c   :  { %v4473_v4 = vpop.permute.xlu1 %1658 }
 0x11e   :  { %v4475_v1 = vpop.permute.xlu0 %1656 }
 0x120   :  { %v4477_v37 = vpop.permute.xlu1 %1264 }
 0x122   :  { %v1107_v0 = vpop.permute.xlu0 %1106 }
 0x124   :  { %v4479_v25 = vpop.permute.xlu1 %1660 }
 0x126   :  { %v1109_v10 = vpop.permute.xlu0 %1108 }
 0x128   :  { %v1567_v34 = vpop.permute.xlu1 %1566 }
 0x12a   :  { %v1569_v29 = vpop.permute.xlu0 %1568 }
 0x12c   :  { %v1803_v57 = vpop.permute.xlu1 %1802 }
 0x12e   :  { %v4481_v3 = vpop.permute.xlu0 %1114 }
 0x130   :  { %v4483_v31 = vpop.permute.xlu1 %1804 }
 0x132   :  { %v4485_v62 = vpop.permute.xlu0 %1112 }
 0x134   :  { %v4487_v48 = vpop.permute.xlu1 %1574 }
 0x136   :  { %v925_v42 = vpop.permute.xlu0 %924 }
 0x137   :  { %v1828_v27 = vsel %vm1827_vm9, %v625_v23, %v925_v42 }
 0x138   :  { %v4492_v11 = vpop.permute.xlu1 %1810  ;;  %v1838_v22 = vsel %vm1837_vm10, %v1828_v27, %v4330_v30 }
 0x13a   :  { %v927_v40 = vpop.permute.xlu0 %926 }
 0x13b   :  { %v1829_v46 = vsel %vm1827_vm9, %v642_v52, %v927_v40 }
 0x13c   :  { %v4500_v43 = vpop.permute.xlu1 %1572  ;;  %v1839_v36 = vsel %vm1837_vm10, %v1829_v46, %v1107_v0  ;;  %v1848_v0 = vsel %vm1847_vm11, %v1838_v22, %v4351_v16  ;;  %v5318_v46 = vld [vmem:[#allocation15_spill] sm:$0xff] }
 0x13d   :  { %v1849_v45 = vsel %vm1847_vm11, %v1839_v36, %v4373_v49 }
 0x13e   :  { %v1435_v55 = vpop.permute.xlu0 %1434 }
 0x13f   :  { %v1859_v63 = vsel %vm1857_vm12, %v1849_v45, %v1435_v55 }
 0x140   :  { %v4505_v54 = vpop.permute.xlu1 %1118  ;;  %v1869_v39 = vsel %vm1867_vm13, %v1859_v63, %v1567_v34  ;;  %v5321_v63 = vld [vmem:[#allocation29_spill] sm:$0xff] }
 0x141   :  { %v1879_v34 = vsel %vm1877_vm14, %v1869_v39, %v4434_v60 }
 0x142   :  { %v929_v38 = vpop.permute.xlu0 %928 }
 0x143   :  { %v1830_v20 = vsel %vm1827_vm9, %v659_v26, %v929_v38 }
 0x144   :  { %v1840_v42 = vsel %vm1837_vm10, %v1830_v20, %v1109_v10  ;;  %v1433_v2 = vpop.permute.xlu1 %1432 }
 0x145   :  { %v1858_v30 = vsel %vm1857_vm12, %v1848_v0, %v1433_v2  ;;  %v1850_v47 = vsel %vm1847_vm11, %v1840_v42, %v4405_v59  ;;  %v694_v59 = vcombine.low %v3846_v9, %v3653_v28  ;;  %v5320_v0 = vld [vmem:[#allocation18_spill] sm:$0xff] }
 0x146   :  { %v1868_v49 = vsel %vm1867_vm13, %v1858_v30, %v4368_v58  ;;  %v1437_v56 = vpop.permute.xlu0 %1436 }
 0x147   :  { %v1878_v10 = vsel %vm1877_vm14, %v1868_v49, %v4393_v51  ;;  %v1860_v16 = vsel %vm1857_vm12, %v1850_v47, %v1437_v56  ;;  %v5317_v51 = vld [vmem:[#allocation20_spill] sm:$0xff]  ;;  %v702_v9 = vrot.slane %v694_v59, %v3480_v53 }
 0x148   :  { %v1733_v40 = vpop.permute.xlu1 %1732  ;;  %v1870_v23 = vsel %vm1867_vm13, %v1860_v16, %v1569_v29  ;;  %v676_v27 = vcombine.low %v5318_v46, %v5317_v51 }
 0x149   :  { %v1888_v18 = vsel %vm1887_vm15, %v1878_v10, %v1733_v40  ;;  %v1880_v29 = vsel %vm1877_vm14, %v1870_v23, %v4458_v12  ;;  %v710_v60 = vcombine.low %v702_v9, %v4029_v35 }
 0x14a   :  { %v931_v52 = vpop.permute.xlu0 %930  ;;  %v1898_v58 = vsel %vm1897_vm0, %v1888_v18, %v4413_v24 }
 0x14b   :  { %3102 = vmatmul.mubr.msk.f32.vlgmr.msra.gmra.mrb[0].mxu0 %vm1908_vm7, %v1898_v58  ;;  %v1831_v24 = vsel %vm1827_vm9, %v676_v27, %v931_v52 }
 0x14c   :  { %v1735_v55 = vpop.permute.xlu1 %1734  ;;  %3104 = vmatprep.mubr.msk.f32.mxu0 %vm3267_vm8, %v3266_v21  ;;  %v1841_v26 = vsel %vm1837_vm10, %v1831_v24, %v4448_v32  ;;  %v5319_v32 = vcombine.low %v5300_v50, %v5296_v44 }
 0x14d   :  { %v1889_v28 = vsel %vm1887_vm15, %v1879_v34, %v1735_v55  ;;  %v1851_v42 = vsel %vm1847_vm11, %v1841_v26, %v4422_v17  ;;  %v5322_v17 = vld [vmem:[#allocation30_spill] sm:$0xff] }
 0x14e   :  { %v1737_v36 = vpop.permute.xlu0 %1736  ;;  %v1899_v22 = vsel %vm1897_vm0, %v1889_v28, %v1803_v57  ;;  %v692_v2 = vrot.slane %v5319_v32, %v3480_v53  ;;  %v727_v49 = vcombine.low %v5322_v17, %v5321_v63 }
 0x14f   :  { %v1890_v14 = vsel %vm1887_vm15, %v1880_v29, %v1737_v36  ;;  %3105 = vmatmul.mubr.msk.f32.gmra.mrb[2].mxu0 %vm1908_vm7, %v1899_v22  ;;  %v5324_v22 = vld [vmem:[#allocation28_spill] sm:$0xff] }
 0x150   :  { %v935_v15 = vpop.permute.xlu1 %934  ;;  %3107 = vmatprep.mubr.msk.f32.mxu0 %vm3267_vm8, %v3266_v21  ;;  %v1900_v57 = vsel %vm1897_vm0, %v1890_v14, %v4483_v31 }
 0x151   :  { %v1833_v38 = vsel %vm1827_vm9, %v710_v60, %v935_v15 }
 0x152   :  { %v1843_v12 = vsel %vm1837_vm10, %v1833_v38, %v4481_v3  ;;  %v1443_v45 = vpop.permute.xlu0 %1442 }
 0x153   :  { %v1853_v20 = vsel %vm1847_vm11, %v1843_v12, %v4464_v6  ;;  %3108 = vmatmul.mubr.msk.f32.gmra.mrb[4].mxu0 %vm1908_vm7, %v1900_v57  ;;  %v693_v6 = vcombine.low %v5320_v0, %v692_v2  ;;  %v5325_v0 = vld [vmem:[#allocation31_spill] sm:$0xff] }
 0x154   :  { %v1439_v35 = vpop.permute.xlu1 %1438  ;;  %3110 = vmatprep.mubr.msk.f32.mxu0 %vm3267_vm8, %v3266_v21  ;;  %v1863_v31 = vsel %vm1857_vm12, %v1853_v20, %v1443_v45 }
 0x155   :  { %v1861_v3 = vsel %vm1857_vm12, %v1851_v42, %v1439_v35  ;;  %v1873_v50 = vsel %vm1867_vm13, %v1863_v31, %v4487_v48 }
 0x156   :  { %v933_v30 = vpop.permute.xlu0 %932  ;;  %v1871_v47 = vsel %vm1867_vm13, %v1861_v3, %v4444_v7  ;;  %v1883_v48 = vsel %vm1877_vm14, %v1873_v50, %v4473_v4 }
 0x157   :  { %v1832_v56 = vsel %vm1827_vm9, %v693_v6, %v933_v30  ;;  %v1881_v40 = vsel %vm1877_vm14, %v1871_v47, %v4454_v41  ;;  %v761_v6 = vcombine.low %v5325_v0, %v4339_v13 }
 0x158   :  { %v937_v44 = vpop.permute.xlu1 %936  ;;  %v1842_v7 = vsel %vm1837_vm10, %v1832_v56, %v4485_v62 }
 0x159   :  { %v1834_v10 = vsel %vm1827_vm9, %v727_v49, %v937_v44  ;;  %v1852_v41 = vsel %vm1847_vm11, %v1842_v7, %v4462_v19 }
 0x15a   :  { %v1844_v16 = vsel %vm1837_vm10, %v1834_v10, %v4469_v5  ;;  %v1739_v39 = vpop.permute.xlu0 %1738 }
 0x15b   :  { %v1891_v18 = vsel %vm1887_vm15, %v1881_v40, %v1739_v39  ;;  %v1854_v59 = vsel %vm1847_vm11, %v1844_v16, %v4477_v37 }
 0x15c   :  { %v1743_v52 = vpop.permute.xlu1 %1742  ;;  %v1901_v58 = vsel %vm1897_vm0, %v1891_v18, %v4467_v33 }
 0x15d   :  { %v1893_v5 = vsel %vm1887_vm15, %v1883_v48, %v1743_v52  ;;  %3111 = vmatmul.mubr.msk.f32.gmra.mrb[6].mxu0 %vm1908_vm7, %v1901_v58 }
 0x15e   :  { %v1441_v62 = vpop.permute.xlu0 %1440  ;;  %v1903_v23 = vsel %vm1897_vm0, %v1893_v5, %v4492_v11  ;;  %3113 = vmatprep.mubr.msk.f32.mxu0 %vm3267_vm8, %v3266_v21 }
 0x15f   :  { %v1862_v37 = vsel %vm1857_vm12, %v1852_v41, %v1441_v62  ;;  %3117 = vmatmul.mubr.msk.f32.vlgmr.msra.gmra.mrb[0].mxu1 %vm1908_vm7, %v1903_v23 }
 0x160   :  { %v1872_v33 = vsel %vm1867_vm13, %v1862_v37, %v4500_v43  ;;  %v1445_v4 = vpop.permute.xlu1 %1444  ;;  %3119 = vmatprep.mubr.msk.f32.mxu1 %vm3267_vm8, %v3266_v21 }
 0x161   :  { %v1864_v19 = vsel %vm1857_vm12, %v1854_v59, %v1445_v4  ;;  %v1882_v51 = vsel %vm1877_vm14, %v1872_v33, %v4475_v1 }
 0x162   :  { %v1874_v11 = vsel %vm1867_vm13, %v1864_v19, %v4471_v61  ;;  %v939_v46 = vpop.permute.xlu0 %938 }
 0x163   :  { %v1884_v27 = vsel %vm1877_vm14, %v1874_v11, %v4479_v25  ;;  %v5323_v25 = vld [vmem:[#allocation33_spill] sm:$0xff] }
 0x164   :  { %v1741_v55 = vpop.permute.xlu1 %1740  ;;  %v744_v14 = vcombine.low %v5324_v22, %v5323_v25 }
 0x165   :  { %v1892_v36 = vsel %vm1887_vm15, %v1882_v51, %v1741_v55 }
 0x166   :  { %v1267_v34 = vpop.permute.xlu0 %1266  ;;  %v1835_v15 = vsel %vm1827_vm9, %v744_v14, %v939_v46 }
 0x167   :  { %v1845_v12 = vsel %vm1837_vm10, %v1835_v15, %v4505_v54 }
 0x168   :  { %v1447_v28 = vpop.permute.xlu1 %1446  ;;  %v1855_v45 = vsel %vm1847_vm11, %v1845_v12, %v1267_v34 }
 0x169   :  { %v1865_v35 = vsel %vm1857_vm12, %v1855_v45, %v1447_v28 }
 0x16a   :  { %v1745_v43 = vpop.permute.xlu0 %1744 }
 0x16b   :  { %v1894_v9 = vsel %vm1887_vm15, %v1884_v27, %v1745_v43 }
 0x16c   :  { %v1813_v24 = vpop.permute.xlu1 %1812 }
 0x16d   :  { %v1904_v29 = vsel %vm1897_vm0, %v1894_v9, %v1813_v24 }
 0x16e   :  { %3120 = vmatmul.mubr.msk.f32.gmra.mrb[2].mxu1 %vm1908_vm7, %v1904_v29  ;;  %v1809_v1 = vpop.permute.xlu0 %1808 }
 0x16f   :  { %v1902_v61 = vsel %vm1897_vm0, %v1892_v36, %v1809_v1  ;;  %3122 = vmatprep.mubr.msk.f32.mxu1 %vm3267_vm8, %v3266_v21 }
 0x170   :  { %v1579_v60 = vpop.permute.xlu1 %1578  ;;  %3114 = vmatmul.mubr.msk.f32.gmra.mrb[8].mxu0 %vm1908_vm7, %v1902_v61 }
 0x171   :  { %v1875_v42 = vsel %vm1867_vm13, %v1865_v35, %v1579_v60 }
 0x172   :  { %v941_v26 = vpop.permute.xlu0 %940 }
 0x173   :  { %v1836_v47 = vsel %vm1827_vm9, %v761_v6, %v941_v26 }
 0x174   :  { %v1663_v38 = vpop.permute.xlu1 %1662 }
 0x175   :  { %v1885_v2 = vsel %vm1877_vm14, %v1875_v42, %v1663_v38 }
 0x176   :  { %v1121_v57 = vpop.permute.xlu0 %1120 }
 0x177   :  { %v1846_v63 = vsel %vm1837_vm10, %v1836_v47, %v1121_v57 }
 0x178   :  { %v1747_v20 = vpop.permute.xlu1 %1746 }
 0x179   :  { %v1895_v3 = vsel %vm1887_vm15, %v1885_v2, %v1747_v20 }
 0x17a   :  { %v1269_v32 = vpop.permute.xlu0 %1268 }
 0x17b   :  { %v1856_v17 = vsel %vm1847_vm11, %v1846_v63, %v1269_v32 }
 0x17c   :  { %v1815_v31 = vpop.permute.xlu1 %1814 }
 0x17d   :  { %v1905_v30 = vsel %vm1897_vm0, %v1895_v3, %v1815_v31 }
 0x17e   :  { %3123 = vmatmul.mubr.msk.f32.gmra.mrb[4].mxu1 %vm1908_vm7, %v1905_v30  ;;  %v1449_v54 = vpop.permute.xlu0 %1448 }
 0x17f   :  { %3125 = vmatprep.mubr.msk.f32.mxu1 %vm3267_vm8, %v3266_v21  ;;  %v1866_v56 = vsel %vm1857_vm12, %v1856_v17, %v1449_v54 }
 0x180   :  { %v1665_v49 = vpop.permute.xlu1 %1664 }
 0x182   :  { %v1581_v44 = vpop.permute.xlu0 %1580 }
 0x183   :  { %v1876_v13 = vsel %vm1867_vm13, %v1866_v56, %v1581_v44 }
 0x184   :  { %v1886_v50 = vsel %vm1877_vm14, %v1876_v13, %v1665_v49  ;;  %v1817_v16 = vpop.permute.xlu1 %1816 }
 0x186   :  { %v1749_v10 = vpop.permute.xlu0 %1748 }
 0x187   :  { %v1896_v40 = vsel %vm1887_vm15, %v1886_v50, %v1749_v10 }
 0x188   :  { %v1906_v39 = vsel %vm1897_vm0, %v1896_v40, %v1817_v16 }
 0x189   :  { %3126 = vmatmul.mubr.msk.f32.gmra.mrb[6].mxu1 %vm1908_vm7, %v1906_v39 }
 0x18a   :  { %3136 = vmatprep.mubr.msk.f32.mxu1 %vm3267_vm8, %v3266_v21 }
 0x21e   :  { %v4649_v7 = vpop.f32.mrb[0].mxu0 }
 0x21f   :  { %v2051_v18 = vmul.f32 %v4649_v7, %v4649_v7  ;;  %v3103_v59 = vpop.f32.mrb[1].mxu0 }
 0x221   :  { %2069 = vrot.lane.b32.xlu0 %v2051_v18, %s3258_s0 }
 0x222   :  { %v4654_v52 = vpop.f32.mrb[2].mxu0 }
 0x223   :  { %v2052_v48 = vmul.f32 %v4654_v52, %v4654_v52  ;;  %v3106_v58 = vpop.f32.mrb[3].mxu0 }
 0x225   :  { %2071 = vrot.lane.b32.xlu1 %v2052_v48, %s3258_s0 }
 0x226   :  { %v4659_v5 = vpop.f32.mrb[4].mxu0 }
 0x227   :  { %v2053_v21 = vmul.f32 %v4659_v5, %v4659_v5  ;;  %v3109_v41 = vpop.f32.mrb[5].mxu0 }
 0x229   :  { %2073 = vrot.lane.b32.xlu0 %v2053_v21, %s3258_s0 }
 0x230   :  { %v4664_v62 = vpop.f32.mrb[6].mxu0 }
 0x231   :  { %v2054_v23 = vmul.f32 %v4664_v62, %v4664_v62  ;;  %v3112_v37 = vpop.f32.mrb[7].mxu0 }
 0x232   :  { %v4668_v33 = vpop.f32.mrb[0].mxu1 }
 0x233   :  { %v3118_v4 = vpop.f32.mrb[1].mxu1  ;;  %2075 = vrot.lane.b32.xlu1 %v2054_v23, %s3258_s0  ;;  %v2056_v19 = vmul.f32 %v4668_v33, %v4668_v33 }
 0x237   :  { %2079 = vrot.lane.b32.xlu1 %v2056_v19, %s3258_s0 }
 0x241   :  { %v4674_v51 = vpop.f32.mrb[2].mxu1 }
 0x242   :  { %v3121_v11 = vpop.f32.mrb[3].mxu1  ;;  %v2057_v34 = vmul.f32 %v4674_v51, %v4674_v51 }
 0x243   :  { %v4676_v46 = vpop.f32.mrb[8].mxu0 }
 0x244   :  { %v2055_v27 = vmul.f32 %v4676_v46, %v4676_v46  ;;  %v3115_v55 = vpop.f32.mrb[9].mxu0 }
 0x245   :  { %v3268_v55 = vmov 1966171168  }
 0x246   :  { %2077 = vrot.lane.b32.xlu0 %v2055_v27, %s3258_s0 }
 0x24a   :  { %2081 = vrot.lane.b32.xlu0 %v2057_v34, %s3258_s0  ;;  %v2140_v34 = vunpack.c.l.s4 %v3268_v55 }
 0x251   :  { %v4684_v28 = vpop.f32.mrb[4].mxu1 }
 0x252   :  { %v2058_v43 = vmul.f32 %v4684_v28, %v4684_v28  ;;  %v3124_v9 = vpop.f32.mrb[5].mxu1 }
 0x253   :  { %v5326_v9 = vld [vmem:[#allocation4_spill] sm:$0xff] }
 0x254   :  { %2083 = vrot.lane.b32.xlu1 %v2058_v43, %s3258_s0  ;;  %v2141_v43 = vunpack.c.0.s8 %v2140_v34 }
 0x25c   :  { %v4689_v24 = vpop.f32.mrb[6].mxu1 }
 0x25d   :  { %v2059_v29 = vmul.f32 %v4689_v24, %v4689_v24  ;;  %v3127_v36 = vpop.f32.mrb[7].mxu1 }
 0x25f   :  { %2085 = vrot.lane.b32.xlu0 %v2059_v29, %s3258_s0  ;;  %v2144_v29 = vsub.s32 %v2141_v43, %v5326_v9 }
 0x293   :  { %v2070_v1 = vpop.permute.xlu0 %2069 }
 0x294   :  { %v2096_v61 = vsel %vm1837_vm10, %v4649_v7, %v2070_v1 }
 0x295   :  { %v2105_v14 = vsel %vm1857_vm12, %v2096_v61, 0.0 }
 0x297   :  { %v2072_v25 = vpop.permute.xlu1 %2071 }
 0x298   :  { %v2097_v22 = vsel %vm1837_vm10, %v4654_v52, %v2072_v25  ;;  %v2049_v25 = vld [vmem:[%s5203_s3] sm:$0x1]  ;;  %s3270_s3 = smov 48  }
 0x299   :  { %v2106_v60 = vsel %vm1857_vm12, %v2097_v22, 0.0  ;;  %v2162_v22 = vsub.s32 0, %v5326_v9 }
 0x29a   :  { %v2107_v15 = vadd.f32 %v2106_v60, %v2105_v14 }
 0x29b   :  { %v2074_v26 = vpop.permute.xlu0 %2073 }
 0x29c   :  { %v2098_v38 = vsel %vm1837_vm10, %v4659_v5, %v2074_v26 }
 0x29d   :  { %v2108_v12 = vsel %vm1857_vm12, %v2098_v38, 0.0 }
 0x29e   :  { %v2109_v45 = vadd.f32 %v2108_v12, %v2107_v15  ;;  %v2050_v15 = vld [vmem:[%s5204_s4] sm:$0x1]  ;;  %s3271_s4 = smov 40  }
 0x2a5   :  { %v2076_v57 = vpop.permute.xlu1 %2075 }
 0x2a6   :  { %v2099_v20 = vsel %vm1837_vm10, %v4664_v62, %v2076_v57 }
 0x2a7   :  { %v2110_v35 = vsel %vm1857_vm12, %v2099_v20, 0.0 }
 0x2a8   :  { %v2111_v42 = vadd.f32 %v2110_v35, %v2109_v45 }
 0x2a9   :  { %v2080_v32 = vpop.permute.xlu1 %2079 }
 0x2aa   :  { %v2101_v3 = vsel %vm1837_vm10, %v4668_v33, %v2080_v32 }
 0x2ab   :  { %v2114_v30 = vsel %vm1857_vm12, %v2101_v3, 0.0 }
 0x2b8   :  { %v2078_v2 = vpop.permute.xlu0 %2077 }
 0x2b9   :  { %v2100_v31 = vsel %vm1837_vm10, %v4676_v46, %v2078_v2 }
 0x2ba   :  { %v2112_v0 = vsel %vm1857_vm12, %v2100_v31, 0.0 }
 0x2bb   :  { %v2113_v6 = vadd.f32 %v2112_v0, %v2111_v42 }
 0x2bc   :  { %v2082_v54 = vpop.permute.xlu0 %2081 }
 0x2bd   :  { %v2115_v47 = vadd.f32 %v2114_v30, %v2113_v6  ;;  %v2102_v63 = vsel %vm1837_vm10, %v4674_v51, %v2082_v54 }
 0x2be   :  { %v2116_v17 = vsel %vm1857_vm12, %v2102_v63, 0.0 }
 0x2bf   :  { %v2117_v49 = vadd.f32 %v2116_v17, %v2115_v47 }
 0x2c6   :  { %v2084_v56 = vpop.permute.xlu1 %2083 }
 0x2c7   :  { %v2103_v44 = vsel %vm1837_vm10, %v4684_v28, %v2084_v56 }
 0x2c8   :  { %v2118_v13 = vsel %vm1857_vm12, %v2103_v44, 0.0 }
 0x2c9   :  { %v2119_v50 = vadd.f32 %v2118_v13, %v2117_v49 }
 0x2d1   :  { %v2086_v10 = vpop.permute.xlu0 %2085 }
 0x2d2   :  { %v2104_v16 = vsel %vm1837_vm10, %v4689_v24, %v2086_v10 }
 0x2d3   :  { %v2120_v40 = vsel %vm1857_vm12, %v2104_v16, 0.0 }
 0x2d4   :  { %v2121_v39 = vadd.f32 %v2120_v40, %v2119_v50 }
 0x2d6   :  { %v2122_v18 = vrot.slane %v2121_v39, 4 }
 0x2d8   :  { %v2123_v59 = vadd.f32 %v2122_v18, %v2121_v39 }
 0x2da   :  { %v2124_v48 = vrot.slane %v2123_v59, 2 }
 0x2dc   :  { %v2125_v58 = vadd.f32 %v2124_v48, %v2123_v59 }
 0x2de   :  { %v2126_v21 = vrot.slane %v2125_v58, 1 }
 0x2e0   :  { %v2127_v41 = vadd.f32 %v2126_v21, %v2125_v58 }
 0x2e2   :  { %v2128_v23 = vmul.f32 0.013888889, %v2127_v41 }
 0x2e4   :  { %v2129_v37 = vmul.f32 %v2128_v23, %v2128_v23 }
 0x2e6   :  { %2131 = vrot.lane.b32.xlu1 %v2129_v37, %s3258_s0 }
 0x358   :  { %v2132_v4 = vpop.permute.xlu1 %2131 }
 0x359   :  { %v2134_v19 = vsub.f32 %v2128_v23, %v2132_v4 }
 0x35b   :  { %v2135_v11 = vmax.f32 %v2134_v19, 0.0 }
 0x35d   :  { %v2136_v27 = vadd.f32 1e-05, %v2135_v11 }
 0x35f   :  { %3252 = vrsqrt.f32 %v2136_v27 }
 0x369   :  { %v3253_v36 = vpop.eup %3252 }
 0x36a   :  { %v2145_v1 = vrot.slane %v3253_v36, %v2144_v29 }
 0x36c   :  { %v2152_v61 = vrot.slane %v2145_v1, %v2144_v29 }
 0x36e   :  { %2153 = vrot.lane.b32.xlu0 %v2152_v61, %s3269_s1 }
 0x3e0   :  { %v2154_v14 = vpop.permute.xlu0 %2153 }
 0x3e1   :  { %v2156_v60 = vmul.f32 %v2154_v14, %v2049_v25 }
 0x3e3   :  { %v2157_v26 = vmul.f32 %v2156_v60, %v2128_v23  ;;  %v2163_v38 = vrot.slane %v2156_v60, %v2162_v22 }
 0x3e5   :  { %v2158_v12 = vsub.f32 %v2050_v15, %v2157_v26  ;;  %v2165_v45 = vmul.f32 %v2163_v38, %v4649_v7  ;;  %v2166_v57 = vmul.f32 %v2163_v38, %v4654_v52  ;;  %v2167_v35 = vmul.f32 %v2163_v38, %v4659_v5 }
 0x3e6   :  { %v2168_v42 = vmul.f32 %v2163_v38, %v4664_v62  ;;  %v2169_v32 = vmul.f32 %v2163_v38, %v4676_v46  ;;  %v2170_v2 = vmul.f32 %v2163_v38, %v4668_v33  ;;  %v2171_v3 = vmul.f32 %v2163_v38, %v4674_v51 }
 0x3e7   :  { %v4732_v20 = vrot.slane %v2158_v12, %v2162_v22  ;;  %v2172_v31 = vmul.f32 %v2163_v38, %v4684_v28  ;;  %v4741_v0 = vmul.f32 %v2163_v38, %v4689_v24 }
 0x3e9   :  { %v2180_v7 = vadd.f32 %v4732_v20, %v2165_v45  ;;  %v2181_v52 = vadd.f32 %v4732_v20, %v2166_v57  ;;  %v2182_v6 = vadd.f32 %v4732_v20, %v2167_v35  ;;  %v2183_v5 = vadd.f32 %v4732_v20, %v2168_v42 }
 0x3ea   :  { %v2184_v62 = vadd.f32 %v4732_v20, %v2169_v32  ;;  %v2185_v46 = vadd.f32 %v4732_v20, %v2170_v2  ;;  %v2186_v33 = vadd.f32 %v4732_v20, %v2171_v3  ;;  %v2187_v51 = vadd.f32 %v4732_v20, %v2172_v31 }
 0x3eb   :  { %v2189_v28 = vmax.f32 %v2180_v7, 0.0  ;;  %v2190_v30 = vmax.f32 %v2181_v52, 0.0  ;;  %v2191_v24 = vmax.f32 %v2182_v6, 0.0  ;;  %v2192_v54 = vmax.f32 %v2183_v5, 0.0 }
 0x3ec   :  { %v4751_v47 = vmax.f32 %v2184_v62, 0.0  ;;  %v4753_v63 = vmax.f32 %v2185_v46, 0.0  ;;  %v4755_v17 = vmax.f32 %v2186_v33, 0.0  ;;  %v4757_v49 = vmax.f32 %v2187_v51, 0.0 }
 0x3ed   :  { %v2207_v56 = vcombine.high %v2189_v28, %v2189_v28  ;;  %v4760_v44 = vrot.slane %v2189_v28, %v3480_v53  ;;  %v2224_v13 = vcombine.high %v2190_v30, %v2190_v30  ;;  %v4763_v50 = vrot.slane %v2190_v30, %v3480_v53 }
 0x3ee   :  { %v2241_v10 = vcombine.high %v2191_v24, %v2191_v24  ;;  %v4766_v16 = vrot.slane %v2191_v24, %v3480_v53  ;;  %v4769_v40 = vrot.slane %v2192_v54, %v3480_v53  ;;  %v2258_v39 = vcombine.high %v2192_v54, %v2192_v54 }
 0x3ef   :  { %v4772_v18 = vrot.slane %v2207_v56, %v3480_v53  ;;  %v4776_v59 = vcombine.high %v4760_v44, %v4760_v44  ;;  %v4779_v48 = vrot.slane %v2224_v13, %v3480_v53  ;;  %v4783_v58 = vcombine.high %v4763_v50, %v4763_v50 }
 0x3f0   :  { %v4786_v21 = vrot.slane %v2241_v10, %v3480_v53  ;;  %v4790_v41 = vcombine.high %v4766_v16, %v4766_v16  ;;  %v4794_v23 = vcombine.high %v4769_v40, %v4769_v40  ;;  %v4797_v37 = vrot.slane %v2258_v39, %v3480_v53 }
 0x3f1   :  { %v4801_v4 = vcombine.high %v4779_v48, %v4779_v48  ;;  %v2372_v19 = vrot.slane %v4783_v58, 7  ;;  %v2596_v11 = vcombine.low %v4776_v59, %v4772_v18  ;;  %v2597_v27 = vcombine.low %v4763_v50, %v4783_v58 }
 0x3f2   :  { %v4810_v55 = vcombine.high %v4786_v21, %v4786_v21  ;;  %v4814_v34 = vcombine.high %v4772_v18, %v4772_v18  ;;  %v3070_v43 = vrot.slane %v4790_v41, 9  ;;  %v2462_v9 = vcombine.low %v4790_v41, %v4786_v21 }
 0x3f3   :  { %v2604_v29 = vrot.slane %v2596_v11, %v3480_v53  ;;  %v2611_v36 = vrot.slane %v2597_v27, %v3480_v53  ;;  %v2613_v1 = vcombine.low %v4801_v4, %v4766_v16  ;;  %v2461_v61 = vcombine.low %v4779_v48, %v4801_v4 }
 0x3f4   :  { %v2386_v25 = vrot.slane %v4810_v55, 7  ;;  %v2614_v22 = vcombine.low %v4786_v21, %v4810_v55  ;;  %v2445_v14 = vcombine.low %v4814_v34, %v4763_v50  ;;  %v2476_v60 = vrot.slane %v2462_v9, %v3480_v53 }
 0x3f5   :  { %v2612_v15 = vcombine.low %v2604_v29, %v2611_v36  ;;  %v2621_v26 = vrot.slane %v2613_v1, %v3480_v53  ;;  %v2469_v38 = vrot.slane %v2461_v61, %v3480_v53  ;;  %v2677_v12 = vcombine.low %v4769_v40, %v4794_v23 }
 0x3f6   :  { %v2628_v45 = vrot.slane %v2614_v22, %v3480_v53  ;;  %v4837_v57 = vrot.slane %v2445_v14, %v3480_v53  ;;  %v3068_v35 = vrot.slane %v4814_v34, 9  ;;  %v4842_v42 = vcombine.high %v4797_v37, %v4797_v37 }
 0x3f7   :  { %v2684_v32 = vrot.slane %v2677_v12, %v3480_v53  ;;  %v4847_v2 = vrot.slane %v4751_v47, %v3480_v53  ;;  %v4849_v3 = vcombine.low %v2469_v38, %v2476_v60  ;;  %v2740_v31 = vcombine.low %v2611_v36, %v2621_v26 }
 0x3f8   :  { %v2629_v7 = vcombine.low %v2621_v26, %v2628_v45  ;;  %v2676_v52 = vcombine.low %v4837_v57, %v2469_v38  ;;  %v3077_v6 = vrot.slane %v4842_v42, 9  ;;  %v2741_v5 = vcombine.low %v4794_v23, %v4797_v37 }
 0x3f9   :  { %v2685_v62 = vcombine.low %v2476_v60, %v2684_v32  ;;  %v2772_v46 = vcombine.low %v4842_v42, %v4847_v2  ;;  %v4859_v33 = vcombine.high %v4847_v2, %v4847_v2  ;;  %v2292_v51 = vcombine.high %v4753_v63, %v4753_v63 }
 0x3fa   :  { %v3170_v28 = vpack.i.bf16 %v2629_v7, %v2612_v15  ;;  %v2748_v30 = vrot.slane %v2741_v5, %v3480_v53  ;;  %v4866_v24 = vrot.slane %v4753_v63, %v3480_v53  ;;  %v2309_v54 = vcombine.high %v4755_v17, %v4755_v17 }
 0x3fb   :  { %v3175_v56 = vpack.i.bf16 %v2685_v62, %v2676_v52  ;;  %v2779_v13 = vrot.slane %v2772_v46, %v3480_v53  ;;  %v2832_v39 = vcombine.low %v4847_v2, %v4859_v33  ;;  %v4876_v27 = vrot.slane %v2292_v51, %v3480_v53 }
 0x3fc   :  { %3171 = vrot.lane.b32.xlu0 %v3170_v28, %s3264_s26  ;;  %v2749_v11 = vcombine.low %v2628_v45, %v2748_v30  ;;  %v4880_v63 = vcombine.high %v4866_v24, %v4866_v24  ;;  %v4884_v9 = vrot.slane %v4755_v17, %v3480_v53  ;;  %v4889_v1 = vrot.slane %v2309_v54, %v3480_v53 }
 0x3fd   :  { %3176 = vrot.lane.b32.xlu1 %v3175_v56, %s3261_s23  ;;  %v2780_v29 = vcombine.low %v2684_v32, %v2779_v13  ;;  %v2839_v36 = vrot.slane %v2832_v39, %v3480_v53  ;;  %v2326_v61 = vcombine.high %v4757_v49, %v4757_v49  ;;  %v4899_v17 = vrot.slane %v4757_v49, %v3480_v53 }
 0x3fe   :  { %v3180_v22 = vpack.i.bf16 %v2749_v11, %v2740_v31  ;;  %v4895_v14 = vcombine.high %v4884_v9, %v4884_v9  ;;  %v4905_v38 = vcombine.high %v4889_v1, %v4889_v1  ;;  %v2479_v45 = vcombine.low %v4880_v63, %v4876_v27 }
 0x3ff   :  { %v3185_v15 = vpack.i.bf16 %v2780_v29, %v4849_v3  ;;  %v2840_v26 = vcombine.low %v2748_v30, %v2839_v36  ;;  %v4908_v12 = vrot.slane %v2326_v61, %v3480_v53  ;;  %v2275_v49 = vcombine.high %v4751_v47, %v4751_v47 }
 0x400   :  { %v2495_v32 = vcombine.low %v4884_v9, %v4895_v14  ;;  %v4918_v31 = vcombine.high %v4876_v27, %v4876_v27  ;;  %v2496_v47 = vcombine.low %v4905_v38, %v4899_v17  ;;  %v4930_v46 = vrot.slane %v2479_v45, %v3480_v53 }
 0x401   :  { %3186 = vrot.lane.b32.xlu0 %v3185_v15, %s3270_s3  ;;  %3181 = vrot.lane.b32.xlu1 %v3180_v22, %s3271_s4  ;;  %v3190_v52 = vpack.i.bf16 %v2840_v26, %v2629_v7  ;;  %v4924_v5 = vcombine.high %v4908_v12, %v4908_v12  ;;  %v4934_v28 = vrot.slane %v2275_v49, %v3480_v53  ;;  %v3067_v26 = vrot.slane %v4760_v44, 9 }
 0x402   :  { %v2503_v51 = vrot.slane %v2495_v32, %v3480_v53  ;;  %v4938_v7 = vcombine.high %v4899_v17, %v4899_v17  ;;  %v2510_v30 = vrot.slane %v2496_v47, %v3480_v53  ;;  %v2631_v13 = vcombine.low %v4876_v27, %v4918_v31 }
 0x403   :  { %v2687_v54 = vcombine.low %v4908_v12, %v4924_v5  ;;  %v4949_v11 = vcombine.high %v4934_v28, %v4934_v28  ;;  %v2647_v36 = vcombine.low %v4895_v14, %v4889_v1  ;;  %v2362_v49 = vrot.slane %v4776_v59, 7 }
 0x404   :  { %v2686_v39 = vcombine.low %v4930_v46, %v2503_v51  ;;  %v4959_v22 = vrot.slane %v2631_v13, %v3480_v53  ;;  %v2648_v15 = vcombine.low %v4899_v17, %v4938_v7  ;;  %v2369_v13 = vrot.slane %v4763_v50, 7 }
 0x405   :  { %3191 = vrot.lane.b32.xlu0 %v3190_v52, %s3272_s11  ;;  %v4956_v61 = vrot.slane %v2687_v54, %v3480_v53  ;;  %v2630_v45 = vcombine.low %v4949_v11, %v4866_v24  ;;  %v4967_v32 = vrot.slane %v2647_v36, %v3480_v53  ;;  %v2365_v52 = vrot.slane %v4772_v18, 7 }
 0x406   :  { %v4973_v54 = vrot.slane %v2648_v15, %v3480_v53  ;;  %v3069_v29 = vrot.slane %v4779_v48, 9  ;;  %v2363_v56 = vsel %vm3918_vm6, %v3067_v26, %v2362_v49  ;;  %v2364_v36 = vrot.slane %v2362_v49, 2 }
 0x407   :  { %v2695_v47 = vcombine.low %v2510_v30, %v4956_v61  ;;  %v2638_v62 = vrot.slane %v2630_v45, %v3480_v53  ;;  %v2376_v60 = vrot.slane %v4801_v4, 7  ;;  %v2370_v50 = vsel %vm3918_vm6, %v3068_v35, %v2369_v13 }
 0x408   :  { %v4983_v18 = vcombine.low %v4967_v32, %v4973_v54  ;;  %v2371_v15 = vrot.slane %v2369_v13, 2  ;;  %v2366_v45 = vsel %vm3918_vm6, %v2364_v36, %v2365_v52  ;;  %v2383_v35 = vrot.slane %v4786_v21, 7 }
 0x409   :  { %v3200_v10 = vpack.i.bf16 %v2695_v47, %v2686_v39  ;;  %v2646_v48 = vcombine.low %v2638_v62, %v4959_v22  ;;  %v2377_v26 = vsel %vm3918_vm6, %v3069_v29, %v2376_v60  ;;  %v2378_v4 = vrot.slane %v2376_v60, 2 }
 0x40a   :  { %v2373_v34 = vsel %vm3918_vm6, %v2371_v15, %v2372_v19  ;;  %v2379_v39 = vrot.slane %v4766_v16, 7  ;;  %v2516_v49 = vcombine.low %v2363_v56, %v2366_v45  ;;  %v3075_v52 = vrot.slane %v4769_v40, 9 }
 0x40b   :  { %3201 = vrot.lane.b32.xlu1 %v3200_v10, %s3261_s23  ;;  %v3195_v62 = vpack.i.bf16 %v4983_v18, %v2646_v48  ;;  %v2517_v47 = vcombine.low %v2370_v50, %v2373_v34  ;;  %v2418_v29 = vrot.slane %v4794_v23, 7  ;;  %v2384_v58 = vsel %vm3918_vm6, %v3070_v43, %v2383_v35 }
 0x40c   :  { %v2380_v10 = vsel %vm3918_vm6, %v2378_v4, %v2379_v39  ;;  %v2385_v19 = vrot.slane %v2383_v35, 2  ;;  %v2524_v16 = vrot.slane %v2516_v49, %v3480_v53  ;;  %v2421_v56 = vrot.slane %v4797_v37, 7 }
 0x40d   :  { %3196 = vrot.lane.b32.xlu0 %v3195_v62, %s3264_s26  ;;  %v2531_v21 = vrot.slane %v2517_v47, %v3480_v53  ;;  %v2533_v60 = vcombine.low %v2377_v26, %v2380_v10  ;;  %v2419_v40 = vsel %vm3918_vm6, %v3075_v52, %v2418_v29  ;;  %v2420_v23 = vrot.slane %v2418_v29, 2 }
 0x40e   :  { %v2387_v41 = vsel %vm3918_vm6, %v2385_v19, %v2386_v25  ;;  %v2432_v43 = vrot.slane %v4847_v2, 7  ;;  %v2188_v13 = vadd.f32 %v4732_v20, %v4741_v0  ;;  %v5024_v48 = vcombine.low %v2503_v51, %v2510_v30 }
 0x40f   :  { %v2532_v36 = vcombine.low %v2524_v16, %v2531_v21  ;;  %v2534_v50 = vcombine.low %v2384_v58, %v2387_v41  ;;  %v2541_v15 = vrot.slane %v2533_v60, %v3480_v53  ;;  %v2422_v45 = vsel %vm3918_vm6, %v2420_v23, %v2421_v56 }
 0x410   :  { %v2433_v55 = vsel %vm3918_vm6, %v3077_v6, %v2432_v43  ;;  %v2434_v37 = vrot.slane %v2432_v43, 2  ;;  %v2197_v25 = vmax.f32 %v2188_v13, 0.0  ;;  %v2709_v20 = vcombine.low %v2419_v40, %v2422_v45 }
 0x411   :  { %v2548_v2 = vrot.slane %v2534_v50, %v3480_v53  ;;  %v2708_v26 = vcombine.low %v2531_v21, %v2541_v15  ;;  %v3071_v0 = vrot.slane %v4934_v28, 9  ;;  %v5327_v4 = vrot.slane %v4859_v33, 7 }
 0x412   :  { %v2343_v30 = vcombine.high %v2197_v25, %v2197_v25  ;;  %v2350_v34 = vrot.slane %v2197_v25, %v3480_v53  ;;  %v2390_v42 = vrot.slane %v4949_v11, 7  ;;  %v2716_v6 = vrot.slane %v2709_v20, %v3480_v53 }
 0x413   :  { %v2436_v51 = vsel %vm3918_vm6, %v2434_v37, %v5327_v4  ;;  %v2549_v39 = vcombine.low %v2541_v15, %v2548_v2  ;;  %v2393_v49 = vrot.slane %v4866_v24, 7  ;;  %v2397_v19 = vrot.slane %v4876_v27, 7 }
 0x414   :  { %v2802_v35 = vcombine.low %v2433_v55, %v2436_v51  ;;  %v5043_v62 = vrot.slane %v2343_v30, %v3480_v53  ;;  %v5045_v47 = vcombine.high %v2350_v34, %v2350_v34  ;;  %v2391_v33 = vsel %vm3918_vm6, %v3071_v0, %v2390_v42 }
 0x415   :  { %v2392_v52 = vrot.slane %v2390_v42, 2  ;;  %v3205_v29 = vpack.i.bf16 %v2549_v39, %v2532_v36  ;;  %v2717_v10 = vcombine.low %v2548_v2, %v2716_v6  ;;  %v3073_v60 = vrot.slane %v4884_v9, 9 }
 0x416   :  { %v2809_v58 = vrot.slane %v2802_v35, %v3480_v53  ;;  %v3078_v16 = vrot.slane %v5045_v47, 9  ;;  %v2781_v24 = vcombine.low %v5045_v47, %v5043_v62  ;;  %v5328_v41 = vrot.slane %v4880_v63, 9 }
 0x417   :  { %v2394_v21 = vsel %vm3918_vm6, %v2392_v52, %v2393_v49  ;;  %3206 = vrot.lane.b32.xlu1 %v3205_v29, %s3258_s0  ;;  %v3210_v40 = vpack.i.bf16 %v2717_v10, %v2708_v26  ;;  %v2399_v27 = vrot.slane %v2397_v19, 2  ;;  %v2404_v13 = vrot.slane %v4895_v14, 7 }
 0x418   :  { %v2810_v23 = vcombine.low %v2716_v6, %v2809_v58  ;;  %v2398_v56 = vsel %vm3918_vm6, %v5328_v41, %v2397_v19  ;;  %v2788_v43 = vrot.slane %v2781_v24, %v3480_v53  ;;  %v2407_v36 = vrot.slane %v4889_v1, 7 }
 0x419   :  { %v2411_v50 = vrot.slane %v4899_v17, 7  ;;  %3211 = vrot.lane.b32.xlu0 %v3210_v40, %s3262_s24  ;;  %v5329_v15 = vrot.slane %v4918_v31, 7  ;;  %v2550_v45 = vcombine.low %v2391_v33, %v2394_v21  ;;  %v3076_v55 = vrot.slane %v4908_v12, 9 }
 0x41a   :  { %v3215_v9 = vpack.i.bf16 %v2810_v23, %v2549_v39  ;;  %v2789_v37 = vcombine.low %v4956_v61, %v2788_v43  ;;  %v2405_v14 = vsel %vm3918_vm6, %v3073_v60, %v2404_v13  ;;  %v2406_v25 = vrot.slane %v2404_v13, 2 }
 0x41b   :  { %v2401_v63 = vsel %vm3918_vm6, %v2399_v27, %v5329_v15  ;;  %v5330_v1 = vrot.slane %v4905_v38, 9  ;;  %v2413_v31 = vrot.slane %v2411_v50, 2  ;;  %v2558_v26 = vrot.slane %v2550_v45, %v3480_v53 }
 0x41c   :  { %3216 = vrot.lane.b32.xlu1 %v3215_v9, %s3273_s12  ;;  %v2551_v2 = vcombine.low %v2398_v56, %v2401_v63  ;;  %v2425_v12 = vrot.slane %v4924_v5, 7  ;;  %v3230_v61 = vpack.i.bf16 %v2789_v37, %v5024_v48  ;;  %v2408_v20 = vsel %vm3918_vm6, %v2406_v25, %v2407_v36 }
 0x41d   :  { %v2412_v17 = vsel %vm3918_vm6, %v5330_v1, %v2411_v50  ;;  %v2428_v0 = vrot.slane %v2350_v34, 7  ;;  %v2750_v38 = vcombine.low %v4959_v22, %v4967_v32  ;;  %v5331_v4 = vrot.slane %v4938_v7, 7 }
 0x41e   :  { %v2565_v30 = vrot.slane %v2551_v2, %v3480_v53  ;;  %v2567_v42 = vcombine.low %v2405_v14, %v2408_v20  ;;  %v2426_v39 = vsel %vm3918_vm6, %v3076_v55, %v2425_v12  ;;  %3231 = vrot.lane.b32.xlu0 %v3230_v61, %s3270_s3  ;;  %v2427_v35 = vrot.slane %v2425_v12, 2 }
 0x41f   :  { %v2415_v51 = vsel %vm3918_vm6, %v2413_v31, %v5331_v4  ;;  %v2751_v49 = vcombine.low %v4924_v5, %v2350_v34  ;;  %v2359_v22 = vcombine.high %v5043_v62, %v5043_v62  ;;  %v2439_v47 = vrot.slane %v5043_v62, 7 }
 0x420   :  { %v2568_v6 = vcombine.low %v2412_v17, %v2415_v51  ;;  %v2566_v32 = vcombine.low %v2558_v26, %v2565_v30  ;;  %v2575_v7 = vrot.slane %v2567_v42, %v3480_v53  ;;  %v2444_v33 = vcombine.low %v4760_v44, %v4776_v59 }
 0x421   :  { %v2429_v29 = vsel %vm3918_vm6, %v2427_v35, %v2428_v0  ;;  %v2758_v10 = vrot.slane %v2751_v49, %v3480_v53  ;;  %v2442_v58 = vrot.slane %v2359_v22, 7  ;;  %v2841_v19 = vcombine.low %v5043_v62, %v2359_v22 }
 0x422   :  { %v2582_v52 = vrot.slane %v2568_v6, %v3480_v53  ;;  %v2718_v5 = vcombine.low %v2565_v30, %v2575_v7  ;;  %v2719_v34 = vcombine.low %v2426_v39, %v2429_v29  ;;  %v2441_v60 = vrot.slane %v2439_v47, 2 }
 0x423   :  { %v2759_v21 = vcombine.low %v4973_v54, %v2758_v10  ;;  %v2452_v40 = vrot.slane %v2444_v33, %v3480_v53  ;;  %v2848_v59 = vrot.slane %v2841_v19, %v3480_v53  ;;  %v2440_v23 = vsel %vm3918_vm6, %v3078_v16, %v2439_v47 }
 0x424   :  { %v2583_v24 = vcombine.low %v2575_v7, %v2582_v52  ;;  %v2726_v44 = vrot.slane %v2719_v34, %v3480_v53  ;;  %v2443_v27 = vsel %vm3918_vm6, %v2441_v60, %v2442_v58  ;;  %v2478_v36 = vcombine.low %v4934_v28, %v4949_v11  ;;  %vm5151_vm6 = vmpackc.low %vm2899_vm5, %vm2899_vm5 }
 0x425   :  { %v3225_v56 = vpack.i.bf16 %v2759_v21, %v2750_v38  ;;  %v2460_v62 = vcombine.low %v2452_v40, %v4837_v57  ;;  %v2849_v13 = vcombine.low %v2758_v10, %v2848_v59  ;;  %v2811_v54 = vcombine.low %v2440_v23, %v2443_v27 }
 0x426   :  { %v3220_v41 = vpack.i.bf16 %v2583_v24, %v2566_v32  ;;  %v2727_v43 = vcombine.low %v2582_v52, %v2726_v44  ;;  %v3274_v15 = vmov 0.0|0.0   ;;  %v5122_v8 = vrot.slane %v2478_v36, %v3480_v53 }
 0x427   :  { %v3245_v9 = vpack.i.bf16 %v2849_v13, %v4983_v18  ;;  %v2818_v16 = vrot.slane %v2811_v54, %v3480_v53  ;;  %3139 = vmatprep.subr.bf16.mxu1 %v3274_v15 }
 0x428   :  { %3221 = vrot.lane.b32.xlu1 %v3220_v41, %s3258_s0  ;;  %v3235_v50 = vpack.i.bf16 %v2727_v43, %v2718_v5  ;;  %v2494_v63 = vcombine.low %v5122_v8, %v4930_v46 }
 0x429   :  { %v2819_v57 = vcombine.low %v2726_v44, %v2818_v16 }
 0x42a   :  { %3236 = vrot.lane.b32.xlu0 %v3235_v50, %s3262_s24 }
 0x42b   :  { %v3240_v45 = vpack.i.bf16 %v2819_v57, %v2583_v24 }
 0x42c   :  { %3226 = vrot.lane.b32.xlu1 %v3225_v56, %s3271_s4 }
 0x42e   :  { %3246 = vrot.lane.b32.xlu0 %v3245_v9, %s3272_s11 }
 0x430   :  { %3241 = vrot.lane.b32.xlu1 %v3240_v45, %s3273_s12 }
 0x46e   :  { %v3172_v28 = vpop.permute.xlu0 %3171 }
 0x46f   :  { %v3177_v11 = vpop.permute.xlu1 %3176  ;;  %v3174_v31 = vunpack.i.h.bf16 %v3172_v28  ;;  %v3173_v2 = vunpack.i.l.bf16 %v3172_v28 }
 0x470   :  { %v3179_v26 = vunpack.i.h.bf16 %v3177_v11  ;;  %v3178_v12 = vunpack.i.l.bf16 %v3177_v11 }
 0x473   :  { %v3187_v18 = vpop.permute.xlu0 %3186  ;;  %v3182_v55 = vpop.permute.xlu1 %3181 }
 0x474   :  { %v3184_v39 = vunpack.i.h.bf16 %v3182_v55  ;;  %v3183_v6 = vunpack.i.l.bf16 %v3182_v55  ;;  %v3189_v22 = vunpack.i.h.bf16 %v3187_v18  ;;  %v3188_v32 = vunpack.i.l.bf16 %v3187_v18 }
 0x477   :  { %v3192_v37 = vpop.permute.xlu0 %3191 }
 0x478   :  { %v3194_v10 = vunpack.i.h.bf16 %v3192_v37  ;;  %v3193_v58 = vunpack.i.l.bf16 %v3192_v37 }
 0x47d   :  { %v5130_v53 = vpop.permute.xlu1 %3201 }
 0x47e   :  { %v3204_v43 = vunpack.i.h.bf16 %v5130_v53  ;;  %v3203_v13 = vunpack.i.l.bf16 %v5130_v53 }
 0x47f   :  { %v3197_v14 = vpop.permute.xlu0 %3196 }
 0x480   :  { %v3199_v27 = vunpack.i.h.bf16 %v3197_v14 }
 0x489   :  { %v3207_v25 = vpop.permute.xlu1 %3206 }
 0x48a   :  { %v3209_v1 = vunpack.i.h.bf16 %v3207_v25  ;;  %v3208_v17 = vunpack.i.l.bf16 %v3207_v25 }
 0x48b   :  { %v3212_v61 = vpop.permute.xlu0 %3211 }
 0x48c   :  { %v2863_v20 = vsel %vm1837_vm10, %v4849_v3, %v3209_v1  ;;  %v2862_v0 = vsel %vm1837_vm10, %v2460_v62, %v3208_v17  ;;  %v3214_v38 = vunpack.i.h.bf16 %v3212_v61  ;;  %v3213_v4 = vunpack.i.l.bf16 %v3212_v61 }
 0x48d   :  { %v2867_v51 = vsel %vm1857_vm12, %v2863_v20, %v3174_v31  ;;  %v2866_v30 = vsel %vm1857_vm12, %v2862_v0, %v3173_v2  ;;  %v3198_v62 = vunpack.i.l.bf16 %v3197_v14 }
 0x48e   :  { %v3217_v42 = vpop.permute.xlu1 %3216  ;;  %v2870_v35 = vsel %vm1877_vm14, %v2866_v30, %v3178_v12  ;;  %v2871_v49 = vsel %vm1877_vm14, %v2867_v51, %v3179_v26  ;;  %v2898_v51 = vld [vmem:[%s5205_s2] sm:$0xff] }
 0x48f   :  { %v2874_v3 = vsel %vm1897_vm0, %v2870_v35, %v3213_v4  ;;  %v2875_v7 = vsel %vm1897_vm0, %v2871_v49, %v3214_v38  ;;  %v3219_v52 = vunpack.i.h.bf16 %v3217_v42  ;;  %v3218_v29 = vunpack.i.l.bf16 %v3217_v42 }
 0x490   :  { %v2879_v47 = vsel %vm2878_vm1, %v2874_v3, %v3183_v6  ;;  %v2880_v33 = vsel %vm2878_vm1, %v2875_v7, %v3184_v39  ;;  %v3232_v59 = vpop.permute.xlu0 %3231  ;;  %v3275_v49 = vmov 0  }
 0x491   :  { %v2884_v5 = vsel %vm2883_vm2, %v2879_v47, %v3188_v32  ;;  %v2885_v34 = vsel %vm2883_vm2, %v2880_v33, %v3189_v22  ;;  %v3233_v37 = vunpack.i.l.bf16 %v3232_v59  ;;  %3250 = vset.pattern.permute.xlu0 %v3275_v49  ;;  %3251 = vset.pattern.permute.xlu1 %v3275_v49 }
 0x492   :  { %v2889_v19 = vsel %vm2888_vm3, %v2884_v5, %v3218_v29  ;;  %v2890_v24 = vsel %vm2888_vm3, %v2885_v34, %v3219_v52  ;;  %v2986_v34 = vld [vmem:[%s5207_s6] sm:$0xff] }
 0x493   :  { %v2894_v21 = vsel %vm2893_vm4, %v2889_v19, %v3193_v58  ;;  %v2895_v60 = vsel %vm2893_vm4, %v2890_v24, %v3194_v10  ;;  %v2985_v10 = vld [vmem:[%s5206_s5] sm:$0xff] }
 0x494   :  { %v3140_v44 = vpack.c.bf16 %v2895_v60, %v2894_v21 }
 0x496   :  { %3142 = vmatpush3.bf16.xpose.msk.msra.mxu1 %vm5151_vm6, %v3140_v44 }
 0x497   :  { %3143 = vmatprep.subr.bf16.mxu1 %v3274_v15 }
 0x49a   :  { %v3222_v23 = vpop.permute.xlu1 %3221 }
 0x49b   :  { %v3224_v41 = vunpack.i.h.bf16 %v3222_v23  ;;  %v3223_v56 = vunpack.i.l.bf16 %v3222_v23 }
 0x49c   :  { %v3237_v50 = vpop.permute.xlu0 %3236 }
 0x49d   :  { %v2865_v54 = vsel %vm1837_vm10, %v5024_v48, %v3224_v41  ;;  %v2864_v36 = vsel %vm1837_vm10, %v2494_v63, %v3223_v56  ;;  %v3239_v15 = vunpack.i.h.bf16 %v3237_v50  ;;  %v3238_v57 = vunpack.i.l.bf16 %v3237_v50 }
 0x49e   :  { %v2869_v9 = vsel %vm1857_vm12, %v2865_v54, %v3199_v27  ;;  %v2868_v16 = vsel %vm1857_vm12, %v2864_v36, %v3198_v62  ;;  %v3227_v45 = vpop.permute.xlu1 %3226  ;;  %v3234_v48 = vunpack.i.h.bf16 %v3232_v59 }
 0x49f   :  { %v2872_v28 = vsel %vm1877_vm14, %v2868_v16, %v3203_v13  ;;  %v2873_v11 = vsel %vm1877_vm14, %v2869_v9, %v3204_v43  ;;  %v3229_v18 = vunpack.i.h.bf16 %v3227_v45  ;;  %v3228_v55 = vunpack.i.l.bf16 %v3227_v45 }
 0x4a0   :  { %v2876_v46 = vsel %vm1897_vm0, %v2872_v28, %v3238_v57  ;;  %v2877_v8 = vsel %vm1897_vm0, %v2873_v11, %v3239_v15  ;;  %v3247_v14 = vpop.permute.xlu0 %3246 }
 0x4a1   :  { %v2881_v63 = vsel %vm2878_vm1, %v2876_v46, %v3228_v55  ;;  %v2882_v53 = vsel %vm2878_vm1, %v2877_v8, %v3229_v18  ;;  %v3249_v25 = vunpack.i.h.bf16 %v3247_v14  ;;  %v3248_v1 = vunpack.i.l.bf16 %v3247_v14 }
 0x4a2   :  { %v3242_v17 = vpop.permute.xlu1 %3241  ;;  %v2886_v31 = vsel %vm2883_vm2, %v2881_v63, %v3233_v37  ;;  %v2887_v2 = vsel %vm2883_vm2, %v2882_v53, %v3234_v48 }
 0x4a3   :  { %v3244_v26 = vunpack.i.h.bf16 %v3242_v17  ;;  %v3243_v12 = vunpack.i.l.bf16 %v3242_v17 }
 0x4a5   :  { %v2891_v61 = vsel %vm2888_vm3, %v2886_v31, %v3243_v12  ;;  %v2892_v20 = vsel %vm2888_vm3, %v2887_v2, %v3244_v26 }
 0x4a6   :  { %v2896_v0 = vsel %vm2893_vm4, %v2891_v61, %v3248_v1  ;;  %v2897_v38 = vsel %vm2893_vm4, %v2892_v20, %v3249_v25 }
 0x4a7   :  { %v3144_v4 = vpack.c.bf16 %v2897_v38, %v2896_v0 }
 0x4a9   :  { %3146 = vmatpush3.bf16.xpose.msk.msra.mxu1 %vm5151_vm6, %v3144_v4 }
 0x4b0   :  { %3137 = vmatmul.mubr.msk.f32.vlgmr.msra.gmra.mrb[8].mxu1 %vm2899_vm5, %v2898_v51 }
 0x583   :  { %v2981_v30 = vpop.f32.mrb[8].mxu1 }
 0x584   :  { %v2987_v42 = vmul.f32 %v2981_v30, %v2981_v30  ;;  %v3138_v39 = vpop.f32.mrb[9].mxu1  ;;  %v2988_v6 = vsel %vm1897_vm0, %v2981_v30, 0.0 }
 0x585   :  { %2989 = vadd.xlane.f32.xlu1 %v2988_v6 }
 0x586   :  { %v2991_v35 = vsel %vm1897_vm0, %v2987_v42, 0.0 }
 0x587   :  { %2992 = vadd.xlane.f32.xlu0 %v2991_v35 }
 0x612   :  { %v2990_v22 = vpop.xlane.xlu1 %2989 }
 0x613   :  { %v2994_v32 = vmul.f32 0.03125, %v2990_v22 }
 0x614   :  { %v2993_v3 = vpop.xlane.xlu0 %2992 }
 0x615   :  { %v2996_v7 = vmul.f32 %v2994_v32, %v2994_v32  ;;  %v2995_v47 = vmul.f32 0.03125, %v2993_v3 }
 0x617   :  { %v2997_v33 = vsub.f32 %v2995_v47, %v2996_v7 }
 0x619   :  { %v2998_v52 = vmax.f32 %v2997_v33, 0.0 }
 0x61b   :  { %v2999_v29 = vadd.f32 1e-05, %v2998_v52 }
 0x61d   :  { %3254 = vrsqrt.f32 %v2999_v29 }
 0x627   :  { %v3255_v58 = vpop.eup %3254 }
 0x628   :  { %v3001_v5 = vmul.f32 %v3255_v58, %v2985_v10 }
 0x62a   :  { %3006 = vperm.xlu0 %3250, %v3001_v5   ;;  %v3002_v19 = vmul.f32 %v3001_v5, %v2994_v32 }
 0x62c   :  { %v3003_v24 = vsub.f32 %v2986_v34, %v3002_v19 }
 0x62e   :  { %3012 = vperm.xlu1 %3251, %v3003_v24  }
 0x6a9   :  { %v3007_v21 = vpop.permute.xlu0 %3006 }
 0x6aa   :  { %v3009_v60 = vmul.f32 %v3007_v21, %v2981_v30 }
 0x6ad   :  { %v3013_v40 = vpop.permute.xlu1 %3012 }
 0x6ae   :  { %v3015_v44 = vadd.f32 %v3013_v40, %v3009_v60 }
 0x6b0   :  { %v3016_v59 = vmax.f32 %v3015_v44, 0.0 }
 0x6b2   :  { %3018 = vrot.lane.b32.xlu1 %v3016_v59, %s3276_s19  ;;  %3021 = vst.msk [vmem:[%s5208_s7] sm:$0xff] %vm1857_vm12, %v3016_v59 }
 0x724   :  { %v3019_v23 = vpop.permute.xlu1 %3018 }
 0x725   :  { %3022 = vst.msk [vmem:[%s5208_s7 + $0x8] sm:$0xff] %vm1857_vm12, %v3019_v23 }

</bundles_post_ra>
